<compile_context>
chip_gen: v5e
topology: v5e:2x2
jax: 0.10.0
libtpu: 0.0.40
codegen_flags: <defaults>
</compile_context>

<pallas_src>
import jax
import jax.numpy as jnp
import numpy as np
from jax.experimental import pallas as pl
from jax.experimental.pallas import tpu as pltpu

LINEAR_SIZE = 256


# ----------------------------- Pallas kernel ------------------------------- #
def _tower_kernel(x_ref, w1_ref, b1_ref, w2_ref, b2_ref, out_ref):
    """One tower (selected by the grid axis): Linear->tanh->Linear->tanh.

    x_ref : (B, F)  f32   (shared across towers, VMEM-resident)
    w1_ref: (F, H)  bf16  (tower axis squeezed out by the BlockSpec)
    b1_ref: (1, H)  f32
    w2_ref: (H, H)  bf16
    b2_ref: (1, H)  f32
    out   : (B, H)  f32
    """
    # Cast only at the MXU input; all elementwise math stays f32.
    x = x_ref[...].astype(jnp.bfloat16)
    h = jnp.tanh(
        jnp.dot(x, w1_ref[...], preferred_element_type=jnp.float32) + b1_ref[...]
    )
    out_ref[...] = jnp.tanh(
        jnp.dot(h.astype(jnp.bfloat16), w2_ref[...],
                preferred_element_type=jnp.float32) + b2_ref[...]
    )


# --------------------------- parameter helpers ------------------------------ #
def _init_normc(key, out_features, in_features):
    """Deterministic replica of init_normc_: normal(0,1), rows scaled to unit
    L2 norm (PyTorch weight layout is (out, in)); returned transposed (in, out)."""
    w = jax.random.normal(key, (out_features, in_features), dtype=jnp.float32)
    w = w / jnp.sqrt(jnp.sum(w * w, axis=1, keepdims=True))
    return jnp.asarray(w.T)


def make_params(obs_size_flatten, linear_size=LINEAR_SIZE, seed=0):
    keys = jax.random.split(jax.random.PRNGKey(seed), 4)
    zeros = lambda: jnp.zeros((1, linear_size), jnp.float32)  # biases init to 0
    return {
        "w1a": _init_normc(keys[0], linear_size, obs_size_flatten), "b1a": zeros(),
        "w2a": _init_normc(keys[1], linear_size, linear_size),      "b2a": zeros(),
        "w1c": _init_normc(keys[2], linear_size, obs_size_flatten), "b1c": zeros(),
        "w2c": _init_normc(keys[3], linear_size, linear_size),      "b2c": zeros(),
    }


def pack_params(params):
    """Stack actor/critic params on a leading tower axis; weights in bf16.

    In a real training/inference loop this packing (and the bf16 cast) is done
    once and reused, so it is not on the per-step path.
    """
    w1 = jnp.stack([params["w1a"], params["w1c"]]).astype(jnp.bfloat16)  # (2,F,H)
    b1 = jnp.stack([params["b1a"], params["b1c"]])                       # (2,1,H) f32
    w2 = jnp.stack([params["w2a"], params["w2c"]]).astype(jnp.bfloat16)  # (2,H,H)
    b2 = jnp.stack([params["b2a"], params["b2c"]])                       # (2,1,H) f32
    return w1, b1, w2, b2


# ------------------------------- wrapper ------------------------------------ #
def state_encoder_forward(inputs_nchw, states, masks, packed_params):
    """Matches StateEncoder.forward for state_type == 'vector'."""
    del masks  # unused in the 'vector' branch (no GRU)
    B = inputs_nchw.shape[0]
    x = inputs_nchw.reshape(B, -1).astype(jnp.float32)
    F_dim = x.shape[1]
    H = LINEAR_SIZE
    w1, b1, w2, b2 = packed_params

    out = pl.pallas_call(
        _tower_kernel,
        out_shape=jax.ShapeDtypeStruct((2, B, H), jnp.float32),
        grid=(2,),  # tower axis: 0 = actor, 1 = critic
        in_specs=[
            # x is shared by both towers (constant block index -> stays resident)
            pl.BlockSpec((B, F_dim), lambda t: (0, 0)),
            # tower-sliced weights/biases; leading tower dim squeezed out
            pl.BlockSpec((None, F_dim, H), lambda t: (t, 0, 0)),
            pl.BlockSpec((None, 1, H),     lambda t: (t, 0, 0)),
            pl.BlockSpec((None, H, H),     lambda t: (t, 0, 0)),
            pl.BlockSpec((None, 1, H),     lambda t: (t, 0, 0)),
        ],
        out_specs=pl.BlockSpec((None, B, H), lambda t: (t, 0, 0)),
        compiler_params=pltpu.CompilerParams(
            # Towers are independent: lets v7x split them across its 2 TCs;
            # harmless (sequential 2-step loop) on single-TC v5e/v6e.
            dimension_semantics=("parallel",)),
    )(x, w1, b1, w2, b2)

    return {"actor": out[0], "critic": out[1]}, states


# ------------------------------ reference ----------------------------------- #
def _reference_forward(inputs_nchw, states, packed_params):
    """Pure-JAX reference mirroring the kernel math (bf16 MXU inputs, f32 acc)."""
    B = inputs_nchw.shape[0]
    x = inputs_nchw.reshape(B, -1).astype(jnp.float32)
    xb = x.astype(jnp.bfloat16)
    w1, b1, w2, b2 = packed_params

    def tower(t):
        h = jnp.tanh(jnp.dot(xb, w1[t], preferred_element_type=jnp.float32) + b1[t])
        return jnp.tanh(jnp.dot(h.astype(jnp.bfloat16), w2[t],
                                preferred_element_type=jnp.float32) + b2[t])

    return {"actor": tower(0), "critic": tower(1)}, states


# --------------------------------- main -------------------------------------- #
if __name__ == "__main__":
    key = jax.random.PRNGKey(0)
    k_in, _ = jax.random.split(key)

    B = 2
    obs_shape = (4, 16, 16)                       # NCHW observation (C, H, W)
    obs_flat = obs_shape[0] * obs_shape[1] * obs_shape[2]   # 1024 features

    inputs = jax.random.normal(k_in, (B,) + obs_shape, dtype=jnp.float32)
    states = jnp.zeros((B, 1), jnp.float32)       # state_size == 1 (no GRU)
    masks = jnp.ones((B, 1), jnp.float32)

    params = make_params(obs_flat, seed=0)
    packed = pack_params(params)                  # one-time weight packing/cast

    out, new_states = state_encoder_forward(inputs, states, masks, packed)
    jax.block_until_ready(out["actor"])
    jax.block_until_ready(out["critic"])
    jax.block_until_ready(new_states)

    # correctness check against a pure-JAX reference (same bf16 weight math)
    ref_out, ref_states = _reference_forward(inputs, states, packed)
    np.testing.assert_allclose(np.asarray(out["actor"]),
                               np.asarray(ref_out["actor"]),
                               rtol=2e-3, atol=2e-3)
    np.testing.assert_allclose(np.asarray(out["critic"]),
                               np.asarray(ref_out["critic"]),
                               rtol=2e-3, atol=2e-3)
    np.testing.assert_allclose(np.asarray(new_states), np.asarray(ref_states))

    print("KERNEL_OK")
</pallas_src>

<mosaic_0001>
module attributes {stable_mosaic.version = 11 : i64} {
  func.func @_tower_kernel(%arg0: i32, %arg1: memref<2x1024xf32, #tpu.memory_space<vmem>>, %arg2: memref<1x1024x256xbf16, #tpu.memory_space<vmem>>, %arg3: memref<1x1x256xf32, #tpu.memory_space<vmem>>, %arg4: memref<1x256x256xbf16, #tpu.memory_space<vmem>>, %arg5: memref<1x1x256xf32, #tpu.memory_space<vmem>>, %arg6: memref<1x2x256xf32, #tpu.memory_space<vmem>>) attributes {dimension_semantics = [#tpu.dimension_semantics<parallel>], iteration_bounds = array<i64: 2>, scalar_prefetch = 0 : i64, scratch_operands = 0 : i64, tpu.core_type = #tpu.core_type<tc>, window_params = [{pipeline_mode = #tpu.pipeline_mode<synchronous>, transform_indices = @transform_0, window_bounds = array<i64: 2, 1024>}, {transform_indices = @transform_1, window_bounds = array<i64: 1, 1024, 256>}, {transform_indices = @transform_2, window_bounds = array<i64: 1, 1, 256>}, {transform_indices = @transform_3, window_bounds = array<i64: 1, 256, 256>}, {transform_indices = @transform_4, window_bounds = array<i64: 1, 1, 256>}, {transform_indices = @transform_5, window_bounds = array<i64: 1, 2, 256>}]} {
    %c0 = arith.constant 0 : index
    %c0_0 = arith.constant 0 : index
    %0 = vector.load %arg1[%c0, %c0_0] : memref<2x1024xf32, #tpu.memory_space<vmem>>, vector<2x1024xf32>
    %1 = arith.truncf %0 : vector<2x1024xf32> to vector<2x1024xbf16>
    %c0_1 = arith.constant 0 : index
    %c0_2 = arith.constant 0 : index
    %c0_3 = arith.constant 0 : index
    %2 = vector.load %arg2[%c0_1, %c0_2, %c0_3] : memref<1x1024x256xbf16, #tpu.memory_space<vmem>>, vector<1x1024x256xbf16>
    %3 = vector.shape_cast %2 : vector<1x1024x256xbf16> to vector<1024x256xbf16>
    %cst = arith.constant dense<0.000000e+00> : vector<2x256xf32>
    %4 = tpu.matmul %1, %3, %cst {dimension_numbers = #tpu.dot_dimension_numbers<[1], [0], [0], [1], [0, 0, 1, 1], [], []>} : vector<2x1024xbf16>, vector<1024x256xbf16>, vector<2x256xf32> -> vector<2x256xf32>
    %c0_4 = arith.constant 0 : index
    %c0_5 = arith.constant 0 : index
    %c0_6 = arith.constant 0 : index
    %5 = vector.load %arg3[%c0_4, %c0_5, %c0_6] : memref<1x1x256xf32, #tpu.memory_space<vmem>>, vector<1x1x256xf32>
    %6 = vector.shape_cast %5 : vector<1x1x256xf32> to vector<1x256xf32>
    %7 = vector.broadcast %6 : vector<1x256xf32> to vector<2x256xf32>
    %8 = arith.addf %4, %7 : vector<2x256xf32>
    %9 = math.tanh %8 : vector<2x256xf32>
    %10 = arith.truncf %9 : vector<2x256xf32> to vector<2x256xbf16>
    %c0_7 = arith.constant 0 : index
    %c0_8 = arith.constant 0 : index
    %c0_9 = arith.constant 0 : index
    %11 = vector.load %arg4[%c0_7, %c0_8, %c0_9] : memref<1x256x256xbf16, #tpu.memory_space<vmem>>, vector<1x256x256xbf16>
    %12 = vector.shape_cast %11 : vector<1x256x256xbf16> to vector<256x256xbf16>
    %cst_10 = arith.constant dense<0.000000e+00> : vector<2x256xf32>
    %13 = tpu.matmul %10, %12, %cst_10 {dimension_numbers = #tpu.dot_dimension_numbers<[1], [0], [0], [1], [0, 0, 1, 1], [], []>} : vector<2x256xbf16>, vector<256x256xbf16>, vector<2x256xf32> -> vector<2x256xf32>
    %c0_11 = arith.constant 0 : index
    %c0_12 = arith.constant 0 : index
    %c0_13 = arith.constant 0 : index
    %14 = vector.load %arg5[%c0_11, %c0_12, %c0_13] : memref<1x1x256xf32, #tpu.memory_space<vmem>>, vector<1x1x256xf32>
    %15 = vector.shape_cast %14 : vector<1x1x256xf32> to vector<1x256xf32>
    %16 = vector.broadcast %15 : vector<1x256xf32> to vector<2x256xf32>
    %17 = arith.addf %13, %16 : vector<2x256xf32>
    %18 = math.tanh %17 : vector<2x256xf32>
    %c0_14 = arith.constant 0 : index
    %c0_15 = arith.constant 0 : index
    %c0_16 = arith.constant 0 : index
    %19 = vector.load %arg6[%c0_14, %c0_15, %c0_16] : memref<1x2x256xf32, #tpu.memory_space<vmem>>, vector<1x2x256xf32>
    %20 = vector.shape_cast %19 : vector<1x2x256xf32> to vector<2x256xf32>
    %21 = vector.shape_cast %18 : vector<2x256xf32> to vector<1x2x256xf32>
    tpu.vector_store %arg6[%c0_14, %c0_15, %c0_16], %21 {strides = array<i32>} : memref<1x2x256xf32, #tpu.memory_space<vmem>>, vector<1x2x256xf32>,
    return
  }
  func.func @transform_0(%arg0: i32) -> (i32, i32) {
    %c0_i32 = arith.constant 0 : i32
    %c0_i32_0 = arith.constant 0 : i32
    %c0_i32_1 = arith.constant 0 : i32
    return %c0_i32, %c0_i32_0 : i32, i32
  }
  func.func @transform_1(%arg0: i32) -> (i32, i32, i32) {
    %c0_i32 = arith.constant 0 : i32
    %c0_i32_0 = arith.constant 0 : i32
    %c0_i32_1 = arith.constant 0 : i32
    return %arg0, %c0_i32, %c0_i32_0 : i32, i32, i32
  }
  func.func @transform_2(%arg0: i32) -> (i32, i32, i32) {
    %c0_i32 = arith.constant 0 : i32
    %c0_i32_0 = arith.constant 0 : i32
    %c0_i32_1 = arith.constant 0 : i32
    return %arg0, %c0_i32, %c0_i32_0 : i32, i32, i32
  }
  func.func @transform_3(%arg0: i32) -> (i32, i32, i32) {
    %c0_i32 = arith.constant 0 : i32
    %c0_i32_0 = arith.constant 0 : i32
    %c0_i32_1 = arith.constant 0 : i32
    return %arg0, %c0_i32, %c0_i32_0 : i32, i32, i32
  }
  func.func @transform_4(%arg0: i32) -> (i32, i32, i32) {
    %c0_i32 = arith.constant 0 : i32
    %c0_i32_0 = arith.constant 0 : i32
    %c0_i32_1 = arith.constant 0 : i32
    return %arg0, %c0_i32, %c0_i32_0 : i32, i32, i32
  }
  func.func @transform_5(%arg0: i32) -> (i32, i32, i32) {
    %c0_i32 = arith.constant 0 : i32
    %c0_i32_0 = arith.constant 0 : i32
    %c0_i32_1 = arith.constant 0 : i32
    return %arg0, %c0_i32, %c0_i32_0 : i32, i32, i32
  }
}

</mosaic_0001>

<bundles_post_ra>
// kernel: tpu_custom_call.1
= control target key start
LH: loop header
LB: loop body
LE: loop exit
PB: predicated region body
PF: predicated region fallthrough
CT: control target
= control target key end

     0   :  { %s3565_s0 = inlined_call_operand.hbm [shape: f32[2,1024], index: 0, kind: input, shape index: {}]   ;;  %s3566_s1 = inlined_call_operand.hbm [shape: bf16[2,1024,256], index: 1, kind: input, shape index: {}]   ;;  %s3567_s2 = inlined_call_operand.hbm [shape: f32[2,1,256], index: 2, kind: input, shape index: {}]   ;;  %s3568_s3 = inlined_call_operand.hbm [shape: bf16[2,256,256], index: 3, kind: input, shape index: {}]   ;;  %s3569_s4 = inlined_call_operand.hbm [shape: f32[2,1,256], index: 4, kind: input, shape index: {}]   ;;  %s3570_s5 = inlined_call_operand.hbm [shape: f32[2,2,256], index: 5, kind: output, shape index: {}]  }
   0x1   :  { %3571 = sst [smem:[#allocation17_spill]] %s3565_s0 }
   0x2   :  { %3572 = sst [smem:[#allocation18_spill]] %s3566_s1 }
   0x3   :  { %3573 = sst [smem:[#allocation19_spill]] %s3568_s3 }
   0x4   :  { %10 = vsyncpa [#allocation3], 0 }
   0x5   :  { %11 = vsyncpa [#allocation6], 0 }
   0x6   :  { %13 = vsyncpa [#allocation6 + $0x1], 0 }
   0x7   :  { %14 = vsyncpa [#allocation9], 0 }
   0x8   :  { %16 = vsyncpa [#allocation9 + $0x1], 0 }
   0x9   :  { %17 = vsyncpa [#allocation4], 0 }
   0xa   :  { %19 = vsyncpa [#allocation4 + $0x1], 0  ;;  %s2982_s18 = smov 0   ;;  %s2984_s19 = smov 0  }
   0xb   :  { %s2986_s20 = smov 0   ;;  %s2988_s21 = smov 0  }
   0xc LB: > { %s3003_s22 = sadd.s32 1, %s2947_s21   ;;  %s53_s23 = sadd.s32 1, %s2943_s20  ;;  %s2947_s21 = sphi %s2988_s21, %s3588_s21   ;;  %s2943_s20 = sphi %s2986_s20, %s3587_s20   ;;  %s2939_s19 = sphi %s2984_s19, %s3586_s19   ;;  %s2935_s18 = sphi %s2982_s18, %s3585_s18  }
   0xd   : > { %s50_s24 = ssub.s32 %s2947_s21, %s3003_s22  ;;  %p60_p0 = scmp.ne.s32.totalorder %s2943_s20, %s2939_s19 }
   0xe   : > { %p51_p1 = scmp.eq.s32.totalorder %s50_s24, 0  ;;  %p61_p2 = scmp.eq.s32.totalorder %s2947_s21, 0 }
   0xf   : > { %p2677_p4 = scmp.lt.s32.totalorder %s2947_s21, 2  ;;  %s206_s26 = sand.u32 1, %s2947_s21  }
  0x10   : > { %s3014_s25 = scalar_select %p51_p1, %s2943_s20, %s53_s23  }
  0x11   : > { %p62_p5 = por %p61_p2, %p60_p0  ;;  %s3021_s27 = sand.u32 1, %s2943_s20  }
  0x12   : > { %3574 = sst [smem:[#allocation16_spill]] %s3014_s25  ;;  %s1816_s28 = sshll.u32 %s3021_s27, 10 }
  0x13   : > { %s2478_s29 = sshll.u32 %s2947_s21, 10  ;;  %s3575_s1 = sld [smem:[#allocation18_spill]] }
  0x14   : > { %s210_s9 = scalar_lea.vmem [#allocation5], %s1816_s28  ;;  %p3030_p6 = pnand %p2677_p4, %p62_p5 }
  0x15   : > { %s218_s10 = sshll.u32 %s210_s9, 4  ;;  %s1821_s12 = sshll.u32 %s3021_s27, 8  ;;  %s219_s10 = int_to_ptr.vmem [resolvable:$true] %s218_s10 }
  0x16   : > { %s3037_s13 = scalar_lea.sflag [#allocation6], %s206_s26  ;;  %p2727_p8 = pneg %p3030_p6 }
  0x19   : > { %s215_s7 = scalar_lea.hbm %s3575_s1, %s2478_s29  ;;  %s2730_s23 = scalar_lea.hbm %s3575_s1, 2048 }
  0x1a   : > { %s216_s8 = sshll.u32 %s215_s7, 4  ;;  %s217_s8 = int_to_ptr.hbm [resolvable:$true] %s216_s8 }
  0x1b   : > { %s2723_s14 = sshra.s32 %s217_s8, 4  ;;  %s2724_s14 = int_to_ptr.hbm [resolvable:$true] %s2723_s14 }
  0x1c   : > { %s2725_s15 = scalar_lea.hbm %s2724_s14, 1024  ;;  %p2731_p11 = scmp.lt.s32.totalorder %s2724_s14, %s3575_s1 }
  0x1d   : > { %p2726_p7 = scmp.ne.s32.totalorder %s2724_s14, %s2725_s15  ;;  %p2732_p12 = scmp.lt.s32.totalorder %s2730_s23, %s2725_s15 }
  0x1f   : > { %p2728_p9 = pnand %p2727_p8, %p2726_p7  ;;  %p2733_p13 = por %p2732_p12, %p2731_p11 }
  0x21   : > { %p2729_p10 = pneg %p2728_p9 }
  0x23   : > { %p2734_p1 = pnand %p2733_p13, %p2729_p10 }
  0x25   : > { %2737 = shalt.err (!%p2734_p1)
}
  0x26   : > { %s2949_s29 = smov 128   ;;  %s2950_s30 = smov 8  }
  0x27   : > { %2662 = dma.hbm_to_vmem [thread:$0]  (!%p3030_p6), %s217_s8, 16384, %s219_s10, %s3037_s13, %s2949_s29, %s2949_s29, %s2950_s30  }
  0x28   : > { %s2479_s6 = sshll.u32 %s2947_s21, 8  ;;  %s3577_s3 = sld [smem:[#allocation19_spill]] }
  0x29   : > { %s251_s17 = scalar_lea.vmem [#allocation8], %s1821_s12  ;;  %s3059_s23 = scalar_lea.sflag [#allocation9], %s206_s26 }
  0x2a   : > { %s259_s14 = sshll.u32 %s251_s17, 4  ;;  %s260_s14 = int_to_ptr.vmem [resolvable:$true] %s259_s14 }
  0x2e   : > { %s256_s16 = scalar_lea.hbm %s3577_s3, %s2479_s6  ;;  %s2760_s6 = scalar_lea.hbm %s3577_s3, 512 }
  0x2f   : > { %s257_s15 = sshll.u32 %s256_s16, 4  ;;  %s258_s15 = int_to_ptr.hbm [resolvable:$true] %s257_s15 }
  0x30   : > { %s2753_s24 = sshra.s32 %s258_s15, 4  ;;  %s2754_s24 = int_to_ptr.hbm [resolvable:$true] %s2753_s24 }
  0x31   : > { %s2755_s28 = scalar_lea.hbm %s2754_s24, 256  ;;  %p2761_p7 = scmp.lt.s32.totalorder %s2754_s24, %s3577_s3 }
  0x32   : > { %p2756_p2 = scmp.ne.s32.totalorder %s2754_s24, %s2755_s28  ;;  %p2762_p9 = scmp.lt.s32.totalorder %s2760_s6, %s2755_s28 }
  0x34   : > { %p2758_p4 = pnand %p2756_p2, %p2727_p8  ;;  %p2763_p10 = por %p2762_p9, %p2761_p7 }
  0x36   : > { %p2759_p5 = pneg %p2758_p4 }
  0x38   : > { %p2764_p11 = pnand %p2763_p10, %p2759_p5 }
  0x3a   : > { %2767 = shalt.err (!%p2764_p11)
}
  0x3b   : > { %2668 = dma.hbm_to_vmem [thread:$0]  (!%p3030_p6), %s258_s15, 4096, %s260_s14, %s3059_s23, %s2949_s29, %s2949_s29, %s2950_s30  }
  0x3c   : > { %s3074_s26 = sadd.s32 4294967295, %s2947_s21   ;;  %s1812_s9 = sadd.s32 4294967294, %s2947_s21  }
  0x3d   : > { %p66_p12 = scmp.ne.s32.totalorder %s2939_s19, %s2935_s18  ;;  %p67_p13 = scmp.eq.s32.totalorder %s3074_s26, 0 }
  0x3e   : > { %p168_p1 = scmp.eq.s32.totalorder %s3074_s26, 1  ;;  %p174_p2 = scmp.eq.s32.totalorder %s1812_s9, 1 }
  0x3f   : > { %p1813_p4 = scmp.ge.s32.totalorder %s2947_s21, 1  ;;  %p3084_p5 = por %p67_p13, %p66_p12 }
  0x40   : > { %p3091_p7 = por %p168_p1, %p60_p0  ;;  %p3095_p9 = por %p174_p2, %p66_p12 }
  0x41   : > { %p181_p10 = scmp.lt.s32.totalorder %s2947_s21, 3  ;;  %s3581_s0 = sld [smem:[#allocation17_spill]] }
  0x42   : > { %s1819_s28 = sshll.u32 %s3021_s27, 1  ;;  %s2951_s8 = smov [#allocation2]  }
  0x43   : > { %p3103_p11 = pnand %p1813_p4, %p181_p10  ;;  %s195_s10 = sshll.u32 %s2951_s8, 4  ;;  %s196_s10 = int_to_ptr.vmem [resolvable:$true] %s195_s10 }
  0x44   : > { %s1820_s6 = sshll.u32 %s2947_s21, 1  ;;  %s232_s17 = scalar_lea.vmem [#allocation7], %s1819_s28 }
  0x45   : > { %p2655_p0 = pneg %p3103_p11  ;;  %s236_s9 = scalar_lea.hbm %s3567_s2, %s1820_s6 }
  0x46   : > { %s240_s14 = sshll.u32 %s232_s17, 4  ;;  %s2820_s25 = scalar_lea.hbm %s3567_s2, 4  ;;  %s241_s14 = int_to_ptr.vmem [resolvable:$true] %s240_s14 }
  0x47   : > { %s193_s15 = sshll.u32 %s3581_s0, 4  ;;  %p2656_p12 = pnand %p2655_p0, %p67_p13  ;;  %s194_s15 = int_to_ptr.hbm [resolvable:$true] %s193_s15 }
  0x48   : > { %s238_s0 = sshll.u32 %s236_s9, 4  ;;  %s239_s0 = int_to_ptr.hbm [resolvable:$true] %s238_s0 }
  0x49   : > { %2658 = dma.hbm_to_vmem [thread:$0]  (!%p2656_p12), %s194_s15, 256, %s196_s10, [#allocation3]  }
  0x4a   : > { %s2813_s27 = sshra.s32 %s239_s0, 4  ;;  %s2814_s27 = int_to_ptr.hbm [resolvable:$true] %s2813_s27 }
  0x4b   : > { %s2815_s1 = scalar_lea.hbm %s2814_s27, 2  ;;  %p2821_p10 = scmp.lt.s32.totalorder %s2814_s27, %s3567_s2 }
  0x4c   : > { %p2816_p1 = scmp.ne.s32.totalorder %s2814_s27, %s2815_s1  ;;  %p2822_p0 = scmp.lt.s32.totalorder %s2820_s25, %s2815_s1 }
  0x4e   : > { %p2818_p2 = pnand %p2816_p1, %p2727_p8  ;;  %p2823_p12 = por %p2822_p0, %p2821_p10 }
  0x50   : > { %p2819_p4 = pneg %p2818_p2 }
  0x52   : > { %p2824_p3 = pnand %p2823_p12, %p2819_p4 }
  0x54   : > { %2827 = shalt.err (!%p2824_p3)
}
  0x55   : > { %2665 = dma.hbm_to_vmem [thread:$0]  (!%p3030_p6), %s239_s0, 32, %s241_s14, %s3037_s13  }
  0x56   : > { %s277_s9 = scalar_lea.hbm %s3569_s4, %s1820_s6  ;;  %s273_s3 = scalar_lea.vmem [#allocation10], %s1819_s28 }
  0x57   : > { %s279_s17 = sshll.u32 %s277_s9, 4  ;;  %s281_s8 = sshll.u32 %s273_s3, 4  ;;  %s280_s17 = int_to_ptr.hbm [resolvable:$true] %s279_s17  ;;  %s282_s8 = int_to_ptr.vmem [resolvable:$true] %s281_s8 }
  0x58   : > { %s2843_s12 = sshra.s32 %s280_s17, 4  ;;  %s2850_s0 = scalar_lea.hbm %s3569_s4, 4  ;;  %s2844_s12 = int_to_ptr.hbm [resolvable:$true] %s2843_s12 }
  0x59   : > { %s2845_s1 = scalar_lea.hbm %s2844_s12, 2  ;;  %p2851_p4 = scmp.lt.s32.totalorder %s2844_s12, %s3569_s4 }
  0x5a   : > { %p2846_p1 = scmp.ne.s32.totalorder %s2844_s12, %s2845_s1  ;;  %p2852_p10 = scmp.lt.s32.totalorder %s2850_s0, %s2845_s1 }
  0x5c   : > { %p2848_p3 = pnand %p2846_p1, %p2727_p8  ;;  %p2853_p0 = por %p2852_p10, %p2851_p4 }
  0x5e   : > { %p2849_p2 = pneg %p2848_p3 }
  0x60   : > { %p2854_p12 = pnand %p2853_p0, %p2849_p2 }
  0x62   : > { %2857 = shalt.err (!%p2854_p12)
}
  0x63   : > { %2671 = dma.hbm_to_vmem [thread:$0]  (!%p3030_p6), %s280_s17, 32, %s282_s8, %s3059_s23  }
  0x64   : > { %290 = sbr.rel (%p3103_p11) target bundleno = 538 (0x21a), region = 40 }
  0x69   : > { %2918 = dma.done.wait (%p67_p13), [#allocation3], 256  }
  0x6a   : > { %2920 = vsyncadd (%p67_p13), [#allocation3], 4294967040  ;;  %s297_s28 = sand.u32 1, %s3074_s26   ;;  %s3151_s6 = sand.u32 1, %s2939_s19  }
  0x6b   : > { %s1828_s7 = sshll.u32 %s3151_s6, 10  ;;  %s298_s11 = scalar_lea.sflag [#allocation6], %s297_s28 }
  0x6c   : > { %s3154_s15 = scalar_lea.vmem [#allocation5], %s1828_s7 }
  0x6d   : > { %2922 = dma.done.wait (%p3084_p5), %s298_s11, 16416  }
  0x6e   : > { %2924 = vsyncadd (%p3084_p5), %s298_s11, 4294950880  ;;  %s1829_s23 = sshll.u32 %s3151_s6, 1  ;;  %s1830_s24 = sshll.u32 %s3151_s6, 8 }
  0x6f   : > { %s3164_s10 = scalar_lea.vmem [#allocation7], %s1829_s23  ;;  %s318_s9 = scalar_lea.sflag [#allocation9], %s297_s28 }
  0x70   : > { %s3166_s17 = scalar_lea.vmem [#allocation8], %s1830_s24 }
  0x71   : > { %2926 = dma.done.wait (%p3084_p5), %s318_s9, 4128  }
  0x72   : > { %2928 = vsyncadd (%p3084_p5), %s318_s9, 4294963168  ;;  %v1891_v0 = vld [vmem:[%s3154_s15 + $0x70] sm:$0xf]  ;;  %v2495_v1 = vld [vmem:[%s3154_s15 + $0x74] sm:$0xf0]  ;;  %s331_s16 = scalar_lea.vmem [#allocation10], %s1829_s23 }
  0x73   : > { %v1955_v2 = vld [vmem:[%s3154_s15 + $0xf0] sm:$0xf]  ;;  %v1892_v3 = vor.u32 %v2495_v1, %v1891_v0  ;;  %v2511_v4 = vld [vmem:[%s3154_s15 + $0xf4] sm:$0xf0]  ;;  %v1883_v11 = vld [vmem:[%s3154_s15 + $0x60] sm:$0xf] }
  0x74   : > { %v2019_v5 = vld [vmem:[%s3154_s15 + $0x170] sm:$0xf]  ;;  %v2527_v6 = vld [vmem:[%s3154_s15 + $0x174] sm:$0xf0]  ;;  %v1956_v7 = vor.u32 %v2511_v4, %v1955_v2  ;;  %v2493_v13 = vld [vmem:[%s3154_s15 + $0x64] sm:$0xf0] }
  0x75   : > { %v2020_v8 = vor.u32 %v2527_v6, %v2019_v5  ;;  %v2083_v9 = vld [vmem:[%s3154_s15 + $0x1f0] sm:$0xf]  ;;  %v2543_v10 = vld [vmem:[%s3154_s15 + $0x1f4] sm:$0xf0]  ;;  %1179 = vmatpush.bf16.msra.mxu0 %v1892_v3  ;;  %v1947_v14 = vld [vmem:[%s3154_s15 + $0xe0] sm:$0xf]  ;;  %v1884_v16 = vor.u32 %v2493_v13, %v1883_v11 }
  0x76   : > { %v2084_v12 = vor.u32 %v2543_v10, %v2083_v9  ;;  %v2509_v15 = vld [vmem:[%s3154_s15 + $0xe4] sm:$0xf0]  ;;  %1192 = vmatpush.bf16.msra.mxu1 %v1956_v7  ;;  %v2011_v18 = vld [vmem:[%s3154_s15 + $0x160] sm:$0xf]  ;;  %v1875_v23 = vld [vmem:[%s3154_s15 + $0x50] sm:$0xf] }
  0x77   : > { %1205 = vmatpush.bf16.msra.mxu2 %v2020_v8  ;;  %v1948_v17 = vor.u32 %v2509_v15, %v1947_v14  ;;  %v2525_v19 = vld [vmem:[%s3154_s15 + $0x164] sm:$0xf0]  ;;  %v2075_v20 = vld [vmem:[%s3154_s15 + $0x1e0] sm:$0xf]  ;;  %v2491_v24 = vld [vmem:[%s3154_s15 + $0x54] sm:$0xf0] }
  0x78   : > { %1218 = vmatpush.bf16.msra.mxu3 %v2084_v12  ;;  %v2012_v21 = vor.u32 %v2525_v19, %v2011_v18  ;;  %v2541_v22 = vld [vmem:[%s3154_s15 + $0x1e4] sm:$0xf0]  ;;  %v1939_v26 = vld [vmem:[%s3154_s15 + $0xd0] sm:$0xf]  ;;  %v2507_v27 = vld [vmem:[%s3154_s15 + $0xd4] sm:$0xf0]  ;;  %v1876_v29 = vor.u32 %v2491_v24, %v1875_v23 }
  0x79   : > { %v2076_v25 = vor.u32 %v2541_v22, %v2075_v20  ;;  %v2003_v28 = vld [vmem:[%s3154_s15 + $0x150] sm:$0xf]  ;;  %1180 = vmatpush.bf16.msra.mxu0 %v1884_v16  ;;  %v2523_v30 = vld [vmem:[%s3154_s15 + $0x154] sm:$0xf0]  ;;  %v1940_v33 = vor.u32 %v2507_v27, %v1939_v26  ;;  %v1867_v35 = vld [vmem:[%s3154_s15 + $0x40] sm:$0xf] }
  0x7a   : > { %v2067_v31 = vld [vmem:[%s3154_s15 + $0x1d0] sm:$0xf]  ;;  %v2539_v32 = vld [vmem:[%s3154_s15 + $0x1d4] sm:$0xf0]  ;;  %1193 = vmatpush.bf16.msra.mxu1 %v1948_v17  ;;  %v2004_v34 = vor.u32 %v2523_v30, %v2003_v28  ;;  %v2489_v36 = vld [vmem:[%s3154_s15 + $0x44] sm:$0xf0] }
  0x7b   : > { %1206 = vmatpush.bf16.msra.mxu2 %v2012_v21  ;;  %v1931_v37 = vld [vmem:[%s3154_s15 + $0xc0] sm:$0xf]  ;;  %v2068_v38 = vor.u32 %v2539_v32, %v2067_v31  ;;  %v2505_v39 = vld [vmem:[%s3154_s15 + $0xc4] sm:$0xf0]  ;;  %v1868_v44 = vor.u32 %v2489_v36, %v1867_v35  ;;  %v1859_v47 = vld [vmem:[%s3154_s15 + $0x30] sm:$0xf] }
  0x7c   : > { %1219 = vmatpush.bf16.msra.mxu3 %v2076_v25  ;;  %v1995_v40 = vld [vmem:[%s3154_s15 + $0x140] sm:$0xf]  ;;  %v2521_v41 = vld [vmem:[%s3154_s15 + $0x144] sm:$0xf0]  ;;  %v1932_v45 = vor.u32 %v2505_v39, %v1931_v37  ;;  %v2487_v48 = vld [vmem:[%s3154_s15 + $0x34] sm:$0xf0] }
  0x7d   : > { %v2059_v42 = vld [vmem:[%s3154_s15 + $0x1c0] sm:$0xf]  ;;  %v2537_v43 = vld [vmem:[%s3154_s15 + $0x1c4] sm:$0xf0]  ;;  %1181 = vmatpush.bf16.msra.mxu0 %v1876_v29  ;;  %v1996_v46 = vor.u32 %v2521_v41, %v1995_v40  ;;  %v1923_v49 = vld [vmem:[%s3154_s15 + $0xb0] sm:$0xf]  ;;  %v1860_v56 = vor.u32 %v2487_v48, %v1859_v47 }
  0x7e   : > { %1194 = vmatpush.bf16.msra.mxu1 %v1940_v33  ;;  %v2060_v50 = vor.u32 %v2537_v43, %v2059_v42  ;;  %v2503_v51 = vld [vmem:[%s3154_s15 + $0xb4] sm:$0xf0]  ;;  %v1987_v52 = vld [vmem:[%s3154_s15 + $0x130] sm:$0xf]  ;;  %v1851_v59 = vld [vmem:[%s3154_s15 + $0x20] sm:$0xf] }
  0x7f   : > { %1207 = vmatpush.bf16.msra.mxu2 %v2004_v34  ;;  %v2519_v53 = vld [vmem:[%s3154_s15 + $0x134] sm:$0xf0]  ;;  %v2051_v54 = vld [vmem:[%s3154_s15 + $0x1b0] sm:$0xf]  ;;  %v1924_v57 = vor.u32 %v2503_v51, %v1923_v49  ;;  %v2485_v60 = vld [vmem:[%s3154_s15 + $0x24] sm:$0xf0] }
  0x80   : > { %1220 = vmatpush.bf16.msra.mxu3 %v2068_v38  ;;  %v2535_v55 = vld [vmem:[%s3154_s15 + $0x1b4] sm:$0xf0]  ;;  %v1988_v58 = vor.u32 %v2519_v53, %v1987_v52  ;;  %v1915_v61 = vld [vmem:[%s3154_s15 + $0xa0] sm:$0xf]  ;;  %v2501_v63 = vld [vmem:[%s3154_s15 + $0xa4] sm:$0xf0]  ;;  %v1852_v4 = vor.u32 %v2485_v60, %v1851_v59 }
  0x81   : > { %1182 = vmatpush.bf16.msra.mxu0 %v1868_v44  ;;  %v2052_v62 = vor.u32 %v2535_v55, %v2051_v54  ;;  %v1979_v0 = vld [vmem:[%s3154_s15 + $0x120] sm:$0xf]  ;;  %v2517_v1 = vld [vmem:[%s3154_s15 + $0x124] sm:$0xf0]  ;;  %v1916_v5 = vor.u32 %v2501_v63, %v1915_v61  ;;  %v1843_v7 = vld [vmem:[%s3154_s15 + $0x10] sm:$0xf] }
  0x82   : > { %1195 = vmatpush.bf16.msra.mxu1 %v1932_v45  ;;  %v2043_v2 = vld [vmem:[%s3154_s15 + $0x1a0] sm:$0xf]  ;;  %v2533_v3 = vld [vmem:[%s3154_s15 + $0x1a4] sm:$0xf0]  ;;  %v1980_v6 = vor.u32 %v2517_v1, %v1979_v0  ;;  %v2483_v8 = vld [vmem:[%s3154_s15 + $0x14] sm:$0xf0] }
  0x83   : > { %1208 = vmatpush.bf16.msra.mxu2 %v1996_v46  ;;  %v1907_v9 = vld [vmem:[%s3154_s15 + $0x90] sm:$0xf]  ;;  %v2044_v10 = vor.u32 %v2533_v3, %v2043_v2  ;;  %v2499_v11 = vld [vmem:[%s3154_s15 + $0x94] sm:$0xf0]  ;;  %v1844_v16 = vor.u32 %v2483_v8, %v1843_v7  ;;  %v1835_v17 = vld [vmem:[%s3154_s15] sm:$0xf] }
  0x84   : > { %1221 = vmatpush.bf16.msra.mxu3 %v2060_v50  ;;  %v1971_v12 = vld [vmem:[%s3154_s15 + $0x110] sm:$0xf]  ;;  %v2515_v13 = vld [vmem:[%s3154_s15 + $0x114] sm:$0xf0]  ;;  %v2481_v18 = vld [vmem:[%s3154_s15 + $0x4] sm:$0xf0]  ;;  %v1908_v19 = vor.u32 %v2499_v11, %v1907_v9 }
  0x85   : > { %1183 = vmatpush.bf16.msra.mxu0 %v1860_v56  ;;  %v2035_v14 = vld [vmem:[%s3154_s15 + $0x190] sm:$0xf]  ;;  %v2531_v15 = vld [vmem:[%s3154_s15 + $0x194] sm:$0xf0]  ;;  %v1972_v20 = vor.u32 %v2515_v13, %v1971_v12  ;;  %v1899_v21 = vld [vmem:[%s3154_s15 + $0x80] sm:$0xf]  ;;  %v1836_v31 = vor.u32 %v2481_v18, %v1835_v17 }
  0x86   : > { %1196 = vmatpush.bf16.msra.mxu1 %v1924_v57  ;;  %v2497_v22 = vld [vmem:[%s3154_s15 + $0x84] sm:$0xf0]  ;;  %v1963_v23 = vld [vmem:[%s3154_s15 + $0x100] sm:$0xf]  ;;  %v2036_v24 = vor.u32 %v2531_v15, %v2035_v14  ;;  %v2147_v28 = vld [vmem:[%s3154_s15 + $0x270] sm:$0xf] }
  0x87   : > { %1209 = vmatpush.bf16.msra.mxu2 %v1988_v58  ;;  %v2513_v25 = vld [vmem:[%s3154_s15 + $0x104] sm:$0xf0]  ;;  %v2027_v26 = vld [vmem:[%s3154_s15 + $0x180] sm:$0xf]  ;;  %v2559_v29 = vld [vmem:[%s3154_s15 + $0x274] sm:$0xf0]  ;;  %v1900_v35 = vor.u32 %v2497_v22, %v1899_v21 }
  0x88   : > { %1222 = vmatpush.bf16.msra.mxu3 %v2052_v62  ;;  %v2529_v27 = vld [vmem:[%s3154_s15 + $0x184] sm:$0xf0]  ;;  %v2211_v30 = vld [vmem:[%s3154_s15 + $0x2f0] sm:$0xf]  ;;  %v2575_v32 = vld [vmem:[%s3154_s15 + $0x2f4] sm:$0xf0]  ;;  %v1964_v36 = vor.u32 %v2513_v25, %v1963_v23  ;;  %v2148_v40 = vor.u32 %v2559_v29, %v2147_v28 }
  0x89   : > { %1184 = vmatpush.bf16.msra.mxu0 %v1852_v4  ;;  %v2275_v33 = vld [vmem:[%s3154_s15 + $0x370] sm:$0xf]  ;;  %v2591_v34 = vld [vmem:[%s3154_s15 + $0x374] sm:$0xf0]  ;;  %v2028_v39 = vor.u32 %v2529_v27, %v2027_v26  ;;  %v2212_v41 = vor.u32 %v2575_v32, %v2211_v30  ;;  %v2139_v43 = vld [vmem:[%s3154_s15 + $0x260] sm:$0xf] }
  0x8a   : > { %1197 = vmatpush.bf16.msra.mxu1 %v1916_v5  ;;  %v2339_v37 = vld [vmem:[%s3154_s15 + $0x3f0] sm:$0xf]  ;;  %v2607_v38 = vld [vmem:[%s3154_s15 + $0x3f4] sm:$0xf0]  ;;  %v2276_v42 = vor.u32 %v2591_v34, %v2275_v33  ;;  %v2557_v44 = vld [vmem:[%s3154_s15 + $0x264] sm:$0xf0] }
  0x8b   : > { %1210 = vmatpush.bf16.msra.mxu2 %v1980_v6  ;;  %v2203_v45 = vld [vmem:[%s3154_s15 + $0x2e0] sm:$0xf]  ;;  %v2340_v46 = vor.u32 %v2607_v38, %v2339_v37  ;;  %v2573_v47 = vld [vmem:[%s3154_s15 + $0x2e4] sm:$0xf0]  ;;  %v374_v52 = vld [vmem:[#allocation2] sm:$0xff]  ;;  %v2140_v53 = vor.u32 %v2557_v44, %v2139_v43  ;;  %s1832_s3 = sshll.u32 %s3151_s6, 2 }
  0x8c   : > { %1223 = vmatpush.bf16.msra.mxu3 %v2044_v10  ;;  %v2267_v48 = vld [vmem:[%s3154_s15 + $0x360] sm:$0xf]  ;;  %v2589_v49 = vld [vmem:[%s3154_s15 + $0x364] sm:$0xf0]  ;;  %378 = vst [vmem:[#allocation1] ss:$4 sm:$0xff] %v374_v52  ;;  %v2204_v54 = vor.u32 %v2573_v47, %v2203_v45 }
  0x8d   : > { %1185 = vmatpush.bf16.msra.mxu0 %v1844_v16  ;;  %v2331_v50 = vld [vmem:[%s3154_s15 + $0x3e0] sm:$0xf]  ;;  %v2605_v51 = vld [vmem:[%s3154_s15 + $0x3e4] sm:$0xf0]  ;;  %v2268_v55 = vor.u32 %v2589_v49, %v2267_v48  ;;  %v2131_v56 = vld [vmem:[%s3154_s15 + $0x250] sm:$0xf] }
  0x8e   : > { %1198 = vmatpush.bf16.msra.mxu1 %v1908_v19  ;;  %v2555_v57 = vld [vmem:[%s3154_s15 + $0x254] sm:$0xf0]  ;;  %v2195_v58 = vld [vmem:[%s3154_s15 + $0x2d0] sm:$0xf]  ;;  %v2332_v59 = vor.u32 %v2605_v51, %v2331_v50  ;;  %v2123_v2 = vld [vmem:[%s3154_s15 + $0x240] sm:$0xf] }
  0x8f   : > { %1211 = vmatpush.bf16.msra.mxu2 %v1972_v20  ;;  %v2571_v60 = vld [vmem:[%s3154_s15 + $0x2d4] sm:$0xf0]  ;;  %v2259_v61 = vld [vmem:[%s3154_s15 + $0x350] sm:$0xf]  ;;  %v2132_v1 = vor.u32 %v2555_v57, %v2131_v56  ;;  %v2553_v3 = vld [vmem:[%s3154_s15 + $0x244] sm:$0xf0] }
  0x90   : > { %1224 = vmatpush.bf16.msra.mxu3 %v2036_v24  ;;  %v2587_v62 = vld [vmem:[%s3154_s15 + $0x354] sm:$0xf0]  ;;  %v2323_v63 = vld [vmem:[%s3154_s15 + $0x3d0] sm:$0xf]  ;;  %v2196_v4 = vor.u32 %v2571_v60, %v2195_v58  ;;  %v2187_v6 = vld [vmem:[%s3154_s15 + $0x2c0] sm:$0xf]  ;;  %v2124_v15 = vor.u32 %v2553_v3, %v2123_v2 }
  0x91   : > { %1186 = vmatpush.bf16.msra.mxu0 %v1836_v31  ;;  %v2603_v0 = vld [vmem:[%s3154_s15 + $0x3d4] sm:$0xf0]  ;;  %v2260_v5 = vor.u32 %v2587_v62, %v2259_v61  ;;  %v2569_v7 = vld [vmem:[%s3154_s15 + $0x2c4] sm:$0xf0]  ;;  %v2251_v8 = vld [vmem:[%s3154_s15 + $0x340] sm:$0xf] }
  0x92   : > { %1199 = vmatpush.bf16.msra.mxu1 %v1900_v35  ;;  %v2324_v9 = vor.u32 %v2603_v0, %v2323_v63  ;;  %v2585_v10 = vld [vmem:[%s3154_s15 + $0x344] sm:$0xf0]  ;;  %v2315_v11 = vld [vmem:[%s3154_s15 + $0x3c0] sm:$0xf]  ;;  %v2188_v16 = vor.u32 %v2569_v7, %v2187_v6  ;;  %v2115_v22 = vld [vmem:[%s3154_s15 + $0x230] sm:$0xf] }
  0x93   : > { %1212 = vmatpush.bf16.msra.mxu2 %v1964_v36  ;;  %v2601_v12 = vld [vmem:[%s3154_s15 + $0x3c4] sm:$0xf0]  ;;  %v383_v13 = vld.sshfl [vmem:[#allocation1 + $0x10] sm:$0xff pattern:$0x73625140]  ;;  %v2252_v21 = vor.u32 %v2585_v10, %v2251_v8  ;;  %s2640_s8 = sshll.u32 %s3074_s26, 2 }
  0x94   : > { %1225 = vmatpush.bf16.msra.mxu3 %v2028_v39  ;;  %v381_v14 = vld.sshfl [vmem:[#allocation1] sm:$0xff pattern:$0x73625140]  ;;  %v3268_v17 = vpack.c.bf16 %v383_v13, %v383_v13  ;;  %v384_v19 = vld.sshfl [vmem:[#allocation1 + $0x18] sm:$0xff pattern:$0x73625140]  ;;  %v2316_v27 = vor.u32 %v2601_v12, %v2315_v11  ;;  %s1662_s25 = scalar_lea.hbm %s3570_s5, %s2640_s8 }
  0x95   : > { %1231 = vmatpush.bf16.msrb.mxu0 %v2148_v40  ;;  %v3270_v18 = vpack.c.bf16 %v381_v14, %v381_v14  ;;  %v382_v20 = vld.sshfl [vmem:[#allocation1 + $0x8] sm:$0xff pattern:$0x73625140]  ;;  %v2551_v23 = vld [vmem:[%s3154_s15 + $0x234] sm:$0xf0]  ;;  %v3275_v25 = vpack.c.bf16 %v384_v19, %v384_v19  ;;  %s373_s27 = scalar_lea.vmem [#allocation11], %s1832_s3 }
  0x96   : > { %1244 = vmatpush.bf16.msrb.mxu1 %v2212_v41  ;;  %v2179_v24 = vld [vmem:[%s3154_s15 + $0x2b0] sm:$0xf]  ;;  %v3277_v26 = vpack.c.bf16 %v382_v20, %v382_v20  ;;  %1213 = vmatmul.bf16.vlgmr.msra.gmra.mxu2 %v3268_v17  ;;  %v2567_v28 = vld [vmem:[%s3154_s15 + $0x2b4] sm:$0xf0]  ;;  %v2116_v33 = vor.u32 %v2551_v23, %v2115_v22  ;;  %v2107_v36 = vld [vmem:[%s3154_s15 + $0x220] sm:$0xf] }
  0x97   : > { %1257 = vmatpush.bf16.msrb.mxu2 %v2276_v42  ;;  %v2243_v29 = vld [vmem:[%s3154_s15 + $0x330] sm:$0xf]  ;;  %v2583_v30 = vld [vmem:[%s3154_s15 + $0x334] sm:$0xf0]  ;;  %1187 = vmatmul.bf16.vlgmr.msra.gmra.mxu0 %v3270_v18  ;;  %v2180_v34 = vor.u32 %v2567_v28, %v2179_v24  ;;  %v2549_v37 = vld [vmem:[%s3154_s15 + $0x224] sm:$0xf0] }
  0x98   : > { %1270 = vmatpush.bf16.msrb.mxu3 %v2340_v46  ;;  %v2307_v31 = vld [vmem:[%s3154_s15 + $0x3b0] sm:$0xf]  ;;  %v2599_v32 = vld [vmem:[%s3154_s15 + $0x3b4] sm:$0xf0]  ;;  %1200 = vmatmul.bf16.vlgmr.msra.gmra.mxu1 %v3277_v26  ;;  %v2244_v35 = vor.u32 %v2583_v30, %v2243_v29  ;;  %v2171_v38 = vld [vmem:[%s3154_s15 + $0x2a0] sm:$0xf]  ;;  %v2108_v46 = vor.u32 %v2549_v37, %v2107_v36 }
  0x99   : > { %1232 = vmatpush.bf16.msrb.mxu0 %v2140_v53  ;;  %1226 = vmatmul.bf16.vlgmr.msra.gmra.mxu3 %v3275_v25  ;;  %v2308_v39 = vor.u32 %v2599_v32, %v2307_v31  ;;  %v2565_v40 = vld [vmem:[%s3154_s15 + $0x2a4] sm:$0xf0]  ;;  %v2235_v41 = vld [vmem:[%s3154_s15 + $0x320] sm:$0xf]  ;;  %v375_v45 = vld [vmem:[#allocation2 + $0x8] sm:$0xff]  ;;  %s1664_s0 = sshll.u32 %s373_s27, 4  ;;  %s1665_s0 = int_to_ptr.vmem [resolvable:$true] %s1664_s0 }
  0x9a   : > { %1245 = vmatpush.bf16.msrb.mxu1 %v2204_v54  ;;  %v2581_v42 = vld [vmem:[%s3154_s15 + $0x324] sm:$0xf0]  ;;  %v2299_v43 = vld [vmem:[%s3154_s15 + $0x3a0] sm:$0xf]  ;;  %380 = vst [vmem:[#allocation1 + $0x20] ss:$4 sm:$0xff] %v375_v45  ;;  %v2172_v47 = vor.u32 %v2565_v40, %v2171_v38 }
  0x9b   : > { %1258 = vmatpush.bf16.msrb.mxu2 %v2268_v55  ;;  %v2597_v44 = vld [vmem:[%s3154_s15 + $0x3a4] sm:$0xf0]  ;;  %v2236_v48 = vor.u32 %v2581_v42, %v2235_v41  ;;  %v2099_v49 = vld [vmem:[%s3154_s15 + $0x210] sm:$0xf]  ;;  %v2547_v50 = vld [vmem:[%s3154_s15 + $0x214] sm:$0xf0] }
  0x9c   : > { %1271 = vmatpush.bf16.msrb.mxu3 %v2332_v59  ;;  %v2163_v51 = vld [vmem:[%s3154_s15 + $0x290] sm:$0xf]  ;;  %v2300_v52 = vor.u32 %v2597_v44, %v2299_v43  ;;  %v2563_v53 = vld [vmem:[%s3154_s15 + $0x294] sm:$0xf0]  ;;  %v2091_v58 = vld [vmem:[%s3154_s15 + $0x200] sm:$0xf]  ;;  %v2100_v59 = vor.u32 %v2547_v50, %v2099_v49 }
  0x9d   : > { %1233 = vmatpush.bf16.msrb.mxu0 %v2132_v1  ;;  %v2227_v54 = vld [vmem:[%s3154_s15 + $0x310] sm:$0xf]  ;;  %v2579_v55 = vld [vmem:[%s3154_s15 + $0x314] sm:$0xf0]  ;;  %v2545_v60 = vld [vmem:[%s3154_s15 + $0x204] sm:$0xf0]  ;;  %v2164_v63 = vor.u32 %v2563_v53, %v2163_v51 }
  0x9e   : > { %1246 = vmatpush.bf16.msrb.mxu1 %v2196_v4  ;;  %v2291_v56 = vld [vmem:[%s3154_s15 + $0x390] sm:$0xf]  ;;  %v2595_v57 = vld [vmem:[%s3154_s15 + $0x394] sm:$0xf0]  ;;  %v2155_v61 = vld [vmem:[%s3154_s15 + $0x280] sm:$0xf]  ;;  %v2228_v0 = vor.u32 %v2579_v55, %v2227_v54  ;;  %v2092_v11 = vor.u32 %v2545_v60, %v2091_v58 }
  0x9f   : > { %1259 = vmatpush.bf16.msrb.mxu2 %v2260_v5  ;;  %v2561_v62 = vld [vmem:[%s3154_s15 + $0x284] sm:$0xf0]  ;;  %v2219_v1 = vld [vmem:[%s3154_s15 + $0x300] sm:$0xf]  ;;  %v2292_v4 = vor.u32 %v2595_v57, %v2291_v56  ;;  %v2494_v6 = vld [vmem:[%s3154_s15 + $0x74] sm:$0xf] }
  0xa0   : > { %1272 = vmatpush.bf16.msrb.mxu3 %v2324_v9  ;;  %v2577_v2 = vld [vmem:[%s3154_s15 + $0x304] sm:$0xf0]  ;;  %v2283_v3 = vld [vmem:[%s3154_s15 + $0x380] sm:$0xf]  ;;  %v1893_v7 = vld [vmem:[%s3154_s15 + $0x78] sm:$0xf0] }
  0xa1   : > { %1234 = vmatpush.bf16.msrb.mxu0 %v2124_v15  ;;  %v2593_v5 = vld [vmem:[%s3154_s15 + $0x384] sm:$0xf0]  ;;  %v2510_v8 = vld [vmem:[%s3154_s15 + $0xf4] sm:$0xf]  ;;  %v1957_v9 = vld [vmem:[%s3154_s15 + $0xf8] sm:$0xf0]  ;;  %v2156_v15 = vor.u32 %v2561_v62, %v2155_v61  ;;  %v1896_v23 = vor.u32 %v2494_v6, %v1893_v7 }
  0xa2   : > { %1247 = vmatpush.bf16.msrb.mxu1 %v2188_v16  ;;  %v2526_v10 = vld [vmem:[%s3154_s15 + $0x174] sm:$0xf]  ;;  %v2021_v12 = vld [vmem:[%s3154_s15 + $0x178] sm:$0xf0]  ;;  %v2220_v16 = vor.u32 %v2577_v2, %v2219_v1  ;;  %v2492_v20 = vld [vmem:[%s3154_s15 + $0x64] sm:$0xf]  ;;  %v2284_v22 = vor.u32 %v2593_v5, %v2283_v3  ;;  %v1960_v28 = vor.u32 %v2510_v8, %v1957_v9 }
  0xa3   : > { %1260 = vmatpush.bf16.msrb.mxu2 %v2252_v21  ;;  %v2542_v13 = vld [vmem:[%s3154_s15 + $0x1f4] sm:$0xf]  ;;  %v2085_v14 = vld [vmem:[%s3154_s15 + $0x1f8] sm:$0xf0]  ;;  %v1885_v21 = vld [vmem:[%s3154_s15 + $0x68] sm:$0xf0]  ;;  %v2024_v29 = vor.u32 %v2526_v10, %v2021_v12 }
  0xa4   : > { %1273 = vmatpush.bf16.msrb.mxu3 %v2316_v27  ;;  %v387_v19 = vld.sshfl [vmem:[#allocation1 + $0x30] sm:$0xff pattern:$0x73625140]  ;;  %v385_v24 = vld.sshfl [vmem:[#allocation1 + $0x20] sm:$0xff pattern:$0x73625140]  ;;  %v2088_v32 = vor.u32 %v2542_v13, %v2085_v14  ;;  %v1888_v41 = vor.u32 %v2492_v20, %v1885_v21 }
  0xa5   : > { %1235 = vmatpush.bf16.msrb.mxu0 %v2116_v33  ;;  %v388_v27 = vld.sshfl [vmem:[#allocation1 + $0x38] sm:$0xff pattern:$0x73625140]  ;;  %v386_v31 = vld.sshfl [vmem:[#allocation1 + $0x28] sm:$0xff pattern:$0x73625140]  ;;  %v3323_v33 = vpack.c.bf16 %v387_v19, %v387_v19  ;;  %v3328_v37 = vpack.c.bf16 %v385_v24, %v385_v24 }
  0xa6   : > { %1248 = vmatpush.bf16.msrb.mxu1 %v2180_v34  ;;  %v2508_v30 = vld [vmem:[%s3154_s15 + $0xe4] sm:$0xf]  ;;  %v1949_v34 = vld [vmem:[%s3154_s15 + $0xe8] sm:$0xf0]  ;;  %v3330_v38 = vpack.c.bf16 %v388_v27, %v388_v27  ;;  %v3334_v42 = vpack.c.bf16 %v386_v31, %v386_v31  ;;  %v2490_v45 = vld [vmem:[%s3154_s15 + $0x54] sm:$0xf] }
  0xa7   : > { %1261 = vmatpush.bf16.msrb.mxu2 %v2244_v35  ;;  %v2524_v35 = vld [vmem:[%s3154_s15 + $0x164] sm:$0xf]  ;;  %v2013_v36 = vld [vmem:[%s3154_s15 + $0x168] sm:$0xf0]  ;;  %v1952_v43 = vor.u32 %v2508_v30, %v1949_v34  ;;  %v1941_v49 = vld [vmem:[%s3154_s15 + $0xd8] sm:$0xf0] }
  0xa8   : > { %1274 = vmatpush.bf16.msrb.mxu3 %v2308_v39  ;;  %v2540_v39 = vld [vmem:[%s3154_s15 + $0x1e4] sm:$0xf]  ;;  %v2077_v40 = vld [vmem:[%s3154_s15 + $0x1e8] sm:$0xf0]  ;;  %v2016_v44 = vor.u32 %v2524_v35, %v2013_v36  ;;  %v2522_v50 = vld [vmem:[%s3154_s15 + $0x154] sm:$0xf] }
  0xa9   : > { %1236 = vmatpush.bf16.msrb.mxu0 %v2108_v46  ;;  %v1877_v46 = vld [vmem:[%s3154_s15 + $0x58] sm:$0xf0]  ;;  %v2488_v57 = vld [vmem:[%s3154_s15 + $0x44] sm:$0xf]  ;;  %v1869_v58 = vld [vmem:[%s3154_s15 + $0x48] sm:$0xf0] }
  0xaa   : > { %1249 = vmatpush.bf16.msrb.mxu1 %v2172_v47  ;;  %v2506_v47 = vld [vmem:[%s3154_s15 + $0xd4] sm:$0xf]  ;;  %v2005_v51 = vld [vmem:[%s3154_s15 + $0x158] sm:$0xf0]  ;;  %v1880_v54 = vor.u32 %v2490_v45, %v1877_v46  ;;  %v1933_v61 = vld [vmem:[%s3154_s15 + $0xc8] sm:$0xf0]  ;;  %v1872_v2 = vor.u32 %v2488_v57, %v1869_v58 }
  0xab   : > { %1262 = vmatpush.bf16.msrb.mxu2 %v2236_v48  ;;  %v2080_v48 = vor.u32 %v2540_v39, %v2077_v40  ;;  %v2069_v53 = vld [vmem:[%s3154_s15 + $0x1d8] sm:$0xf0]  ;;  %v1944_v55 = vor.u32 %v2506_v47, %v1941_v49  ;;  %v2008_v56 = vor.u32 %v2522_v50, %v2005_v51  ;;  %v2520_v62 = vld [vmem:[%s3154_s15 + $0x144] sm:$0xf]  ;;  %v2061_v1 = vld [vmem:[%s3154_s15 + $0x1c8] sm:$0xf0] }
  0xac   : > { %1275 = vmatpush.bf16.msrb.mxu3 %v2300_v52  ;;  %v2538_v52 = vld [vmem:[%s3154_s15 + $0x1d4] sm:$0xf]  ;;  %v1861_v6 = vld [vmem:[%s3154_s15 + $0x38] sm:$0xf0]  ;;  %v2484_v19 = vld [vmem:[%s3154_s15 + $0x24] sm:$0xf] }
  0xad   : > { %1237 = vmatpush.bf16.msrb.mxu0 %v2100_v59  ;;  %v2504_v59 = vld [vmem:[%s3154_s15 + $0xc4] sm:$0xf]  ;;  %v2072_v60 = vor.u32 %v2538_v52, %v2069_v53  ;;  %v2486_v5 = vld [vmem:[%s3154_s15 + $0x34] sm:$0xf]  ;;  %v1925_v9 = vld [vmem:[%s3154_s15 + $0xb8] sm:$0xf0] }
  0xae   : > { %1250 = vmatpush.bf16.msrb.mxu1 %v2164_v63  ;;  %v1997_v63 = vld [vmem:[%s3154_s15 + $0x148] sm:$0xf0]  ;;  %v1936_v3 = vor.u32 %v2504_v59, %v1933_v61  ;;  %v2502_v7 = vld [vmem:[%s3154_s15 + $0xb4] sm:$0xf]  ;;  %v2053_v13 = vld [vmem:[%s3154_s15 + $0x1b8] sm:$0xf0]  ;;  %v1864_v14 = vor.u32 %v2486_v5, %v1861_v6 }
  0xaf   : > { %1263 = vmatpush.bf16.msrb.mxu2 %v2228_v0  ;;  %v2536_v0 = vld [vmem:[%s3154_s15 + $0x1c4] sm:$0xf]  ;;  %v2518_v10 = vld [vmem:[%s3154_s15 + $0x134] sm:$0xf]  ;;  %v1853_v20 = vld [vmem:[%s3154_s15 + $0x28] sm:$0xf0] }
  0xb0   : > { %1276 = vmatpush.bf16.msrb.mxu3 %v2292_v4  ;;  %v2000_v4 = vor.u32 %v2520_v62, %v1997_v63  ;;  %v2064_v8 = vor.u32 %v2536_v0, %v2061_v1  ;;  %v2534_v12 = vld [vmem:[%s3154_s15 + $0x1b4] sm:$0xf]  ;;  %v2500_v21 = vld [vmem:[%s3154_s15 + $0xa4] sm:$0xf]  ;;  %v1981_v27 = vld [vmem:[%s3154_s15 + $0x128] sm:$0xf0]  ;;  %v1856_v30 = vor.u32 %v2484_v19, %v1853_v20 }
  0xb1   : > { %1238 = vmatpush.bf16.msrb.mxu0 %v2092_v11  ;;  %v1989_v11 = vld [vmem:[%s3154_s15 + $0x138] sm:$0xf0]  ;;  %v2516_v24 = vld [vmem:[%s3154_s15 + $0x124] sm:$0xf]  ;;  %v2482_v34 = vld [vmem:[%s3154_s15 + $0x14] sm:$0xf] }
  0xb2   : > { %1251 = vmatpush.bf16.msrb.mxu1 %v2156_v15  ;;  %v1928_v15 = vor.u32 %v2502_v7, %v1925_v9  ;;  %v1845_v35 = vld [vmem:[%s3154_s15 + $0x18] sm:$0xf0]  ;;  %v2498_v36 = vld [vmem:[%s3154_s15 + $0x94] sm:$0xf]  ;;  %v2480_v47 = vld [vmem:[%s3154_s15 + $0x4] sm:$0xf] }
  0xb3   : > { %1264 = vmatpush.bf16.msrb.mxu2 %v2220_v16  ;;  %v1992_v16 = vor.u32 %v2518_v10, %v1989_v11  ;;  %v1909_v40 = vld [vmem:[%s3154_s15 + $0x98] sm:$0xf0]  ;;  %v1848_v46 = vor.u32 %v2482_v34, %v1845_v35  ;;  %v2496_v51 = vld [vmem:[%s3154_s15 + $0x84] sm:$0xf]  ;;  %v1901_v52 = vld [vmem:[%s3154_s15 + $0x88] sm:$0xf0] }
  0xb4   : > { %1277 = vmatpush.bf16.msrb.mxu3 %v2284_v22  ;;  %1239 = vmatmul.bf16.vlgmr.msrb.gmra.mxu0 %v3328_v37  ;;  %v2056_v22 = vor.u32 %v2534_v12, %v2053_v13  ;;  %v2037_v45 = vld [vmem:[%s3154_s15 + $0x198] sm:$0xf0]  ;;  %v1912_v49 = vor.u32 %v2498_v36, %v1909_v40  ;;  %v2512_v53 = vld [vmem:[%s3154_s15 + $0x104] sm:$0xf]  ;;  %v2029_v57 = vld [vmem:[%s3154_s15 + $0x188] sm:$0xf0]  ;;  %v1904_v1 = vor.u32 %v2496_v51, %v1901_v52 }
  0xb5   : > { %1283 = vmatpush.bf16.msra.mxu0 %v1896_v23  ;;  %1252 = vmatmul.bf16.vlgmr.msrb.gmra.mxu1 %v3334_v42  ;;  %v1917_v23 = vld [vmem:[%s3154_s15 + $0xa8] sm:$0xf0]  ;;  %v2558_v58 = vld [vmem:[%s3154_s15 + $0x274] sm:$0xf]  ;;  %v2149_v59 = vld [vmem:[%s3154_s15 + $0x278] sm:$0xf0] }
  0xb6   : > { %1296 = vmatpush.bf16.msra.mxu1 %v1960_v28  ;;  %1265 = vmatmul.bf16.vlgmr.msrb.gmra.mxu2 %v3323_v33  ;;  %v2532_v28 = vld [vmem:[%s3154_s15 + $0x1a4] sm:$0xf]  ;;  %v1920_v31 = vor.u32 %v2500_v21, %v1917_v23  ;;  %v2213_v62 = vld [vmem:[%s3154_s15 + $0x2f8] sm:$0xf0]  ;;  %v2590_v63 = vld [vmem:[%s3154_s15 + $0x374] sm:$0xf]  ;;  %v2152_v6 = vor.u32 %v2558_v58, %v2149_v59 }
  0xb7   : > { %1309 = vmatpush.bf16.msra.mxu2 %v2024_v29  ;;  %1278 = vmatmul.bf16.vlgmr.msrb.gmra.mxu3 %v3330_v38  ;;  %v2045_v29 = vld [vmem:[%s3154_s15 + $0x1a8] sm:$0xf0]  ;;  %v2277_v0 = vld [vmem:[%s3154_s15 + $0x378] sm:$0xf0]  ;;  %v2556_v9 = vld [vmem:[%s3154_s15 + $0x264] sm:$0xf] }
  0xb8   : > { %1322 = vmatpush.bf16.msra.mxu3 %v2088_v32  ;;  %v1984_v32 = vor.u32 %v2516_v24, %v1981_v27  ;;  %v2048_v39 = vor.u32 %v2532_v28, %v2045_v29  ;;  %v2141_v10 = vld [vmem:[%s3154_s15 + $0x268] sm:$0xf0]  ;;  %v2572_v11 = vld [vmem:[%s3154_s15 + $0x2e4] sm:$0xf]  ;;  %v2554_v23 = vld [vmem:[%s3154_s15 + $0x254] sm:$0xf] }
  0xb9   : > { %1284 = vmatpush.bf16.msra.mxu0 %v1888_v41  ;;  %v2514_v41 = vld [vmem:[%s3154_s15 + $0x114] sm:$0xf]  ;;  %v2205_v13 = vld [vmem:[%s3154_s15 + $0x2e8] sm:$0xf0]  ;;  %v2144_v20 = vor.u32 %v2556_v9, %v2141_v10  ;;  %v2133_v24 = vld [vmem:[%s3154_s15 + $0x258] sm:$0xf0] }
  0xba   : > { %1297 = vmatpush.bf16.msra.mxu1 %v1952_v43  ;;  %v1973_v43 = vld [vmem:[%s3154_s15 + $0x118] sm:$0xf0]  ;;  %v2333_v19 = vld [vmem:[%s3154_s15 + $0x3e8] sm:$0xf0]  ;;  %v2208_v21 = vor.u32 %v2572_v11, %v2205_v13  ;;  %v2570_v27 = vld [vmem:[%s3154_s15 + $0x2d4] sm:$0xf]  ;;  %v2136_v35 = vor.u32 %v2554_v23, %v2133_v24 }
  0xbb   : > { %1310 = vmatpush.bf16.msra.mxu2 %v2016_v44  ;;  %v2530_v44 = vld [vmem:[%s3154_s15 + $0x194] sm:$0xf]  ;;  %v1976_v50 = vor.u32 %v2514_v41, %v1973_v43  ;;  %v2197_v29 = vld [vmem:[%s3154_s15 + $0x2d8] sm:$0xf0]  ;;  %v2125_v40 = vld [vmem:[%s3154_s15 + $0x248] sm:$0xf0] }
  0xbc   : > { %1323 = vmatpush.bf16.msra.mxu3 %v2080_v48  ;;  %v1837_v48 = vld [vmem:[%s3154_s15 + $0x8] sm:$0xf0]  ;;  %v2325_v34 = vld [vmem:[%s3154_s15 + $0x3d8] sm:$0xf0]  ;;  %v2568_v41 = vld [vmem:[%s3154_s15 + $0x2c4] sm:$0xf] }
  0xbd   : > { %1285 = vmatpush.bf16.msra.mxu0 %v1880_v54  ;;  %v2040_v54 = vor.u32 %v2530_v44, %v2037_v45  ;;  %v1840_v61 = vor.u32 %v2480_v47, %v1837_v48  ;;  %v2189_v43 = vld [vmem:[%s3154_s15 + $0x2c8] sm:$0xf0]  ;;  %v2600_v45 = vld [vmem:[%s3154_s15 + $0x3c4] sm:$0xf]  ;;  %v2566_v51 = vld [vmem:[%s3154_s15 + $0x2b4] sm:$0xf] }
  0xbe   : > { %1298 = vmatpush.bf16.msra.mxu1 %v1944_v55  ;;  %v1965_v55 = vld [vmem:[%s3154_s15 + $0x108] sm:$0xf0]  ;;  %v2192_v47 = vor.u32 %v2568_v41, %v2189_v43  ;;  %v2546_v9 = vld [vmem:[%s3154_s15 + $0x214] sm:$0xf]  ;;  %v2101_v10 = vld [vmem:[%s3154_s15 + $0x218] sm:$0xf0] }
  0xbf   : > { %1311 = vmatpush.bf16.msra.mxu2 %v2008_v56  ;;  %v2528_v56 = vld [vmem:[%s3154_s15 + $0x184] sm:$0xf]  ;;  %v2253_v44 = vld [vmem:[%s3154_s15 + $0x348] sm:$0xf0]  ;;  %v2562_v11 = vld [vmem:[%s3154_s15 + $0x294] sm:$0xf] }
  0xc0   : > { %1324 = vmatpush.bf16.msra.mxu3 %v2072_v60  ;;  %v2574_v60 = vld [vmem:[%s3154_s15 + $0x2f4] sm:$0xf]  ;;  %v2032_v5 = vor.u32 %v2528_v56, %v2029_v57  ;;  %v2309_v57 = vld [vmem:[%s3154_s15 + $0x3b8] sm:$0xf0]  ;;  %v2544_v23 = vld [vmem:[%s3154_s15 + $0x204] sm:$0xf] }
  0xc1   : > { %1286 = vmatpush.bf16.msra.mxu0 %v1872_v2  ;;  %v1968_v2 = vor.u32 %v2512_v53, %v1965_v55  ;;  %v2216_v7 = vor.u32 %v2574_v60, %v2213_v62  ;;  %v2181_v53 = vld [vmem:[%s3154_s15 + $0x2b8] sm:$0xf0]  ;;  %v2598_v56 = vld [vmem:[%s3154_s15 + $0x3b4] sm:$0xf]  ;;  %v2109_v62 = vld [vmem:[%s3154_s15 + $0x228] sm:$0xf0] }
  0xc2   : > { %1299 = vmatpush.bf16.msra.mxu1 %v1936_v3  ;;  %v2606_v3 = vld [vmem:[%s3154_s15 + $0x3f4] sm:$0xf]  ;;  %v2245_v55 = vld [vmem:[%s3154_s15 + $0x338] sm:$0xf0]  ;;  %v2184_v59 = vor.u32 %v2566_v51, %v2181_v53  ;;  %v2093_v24 = vld [vmem:[%s3154_s15 + $0x208] sm:$0xf0] }
  0xc3   : > { %1312 = vmatpush.bf16.msra.mxu2 %v2000_v4  ;;  %v2341_v4 = vld [vmem:[%s3154_s15 + $0x3f8] sm:$0xf0]  ;;  %v2617_v53 = vld [vmem:[%s3166_s17 + $0x44] sm:$0xf0]  ;;  %s1666_s13 = sshll.u32 %s1662_s25, 4  ;;  %vm1646_vm0 = vcmask 1041408   ;;  %s1667_s13 = int_to_ptr.hbm [resolvable:$true] %s1666_s13 }
  0xc4   : > { %1325 = vmatpush.bf16.msra.mxu3 %v2064_v8  ;;  %v2280_v8 = vor.u32 %v2590_v63, %v2277_v0  ;;  %v2344_v12 = vor.u32 %v2606_v3, %v2341_v4  ;;  %v2564_v63 = vld [vmem:[%s3154_s15 + $0x2a4] sm:$0xf]  ;;  %v2312_v0 = vor.u32 %v2598_v56, %v2309_v57  ;;  %v2237_v3 = vld [vmem:[%s3154_s15 + $0x328] sm:$0xf0]  ;;  %v2165_v13 = vld [vmem:[%s3154_s15 + $0x298] sm:$0xf0] }
  0xc5   : > { %1287 = vmatpush.bf16.msra.mxu0 %v1864_v14  ;;  %v2588_v14 = vld [vmem:[%s3154_s15 + $0x364] sm:$0xf]  ;;  %v2623_v41 = vld [vmem:[%s3166_s17 + $0x74] sm:$0xf0]  ;;  %v2381_v56 = vld [vmem:[%s3166_s17 + $0x48] sm:$0xf0] }
  0xc6   : > { %1300 = vmatpush.bf16.msra.mxu1 %v1928_v15  ;;  %v2269_v15 = vld [vmem:[%s3154_s15 + $0x368] sm:$0xf0]  ;;  %v2596_v4 = vld [vmem:[%s3154_s15 + $0x3a4] sm:$0xf]  ;;  %s1651_s26 = scalar_lea.sflag [#allocation4], %s3151_s6  ;;  %s2887_s14 = sshra.s32 %s1667_s13, 4  ;;  %s2888_s14 = int_to_ptr.hbm [resolvable:$true] %s2887_s14 }
  0xc7   : > { %1313 = vmatpush.bf16.msra.mxu2 %v1992_v16  ;;  %v2604_v16 = vld [vmem:[%s3154_s15 + $0x3e4] sm:$0xf]  ;;  %s2889_s28 = scalar_lea.hbm %s2888_s14, 4  ;;  %p2894_p5 = scmp.lt.s32.totalorder %s2888_s14, %s3570_s5 }
  0xc8   : > { %1326 = vmatpush.bf16.msra.mxu3 %v2056_v22  ;;  %v2272_v22 = vor.u32 %v2588_v14, %v2269_v15  ;;  %v2336_v28 = vor.u32 %v2604_v16, %v2333_v19  ;;  %v2578_v14 = vld [vmem:[%s3154_s15 + $0x314] sm:$0xf]  ;;  %v2229_v15 = vld [vmem:[%s3154_s15 + $0x318] sm:$0xf0]  ;;  %p2890_p6 = scmp.ne.s32.totalorder %s2888_s14, %s2889_s28 }
  0xc9   : > { %1288 = vmatpush.bf16.msra.mxu0 %v1856_v30  ;;  %v2586_v30 = vld [vmem:[%s3154_s15 + $0x354] sm:$0xf]  ;;  %v2293_v19 = vld [vmem:[%s3154_s15 + $0x398] sm:$0xf0] }
  0xca   : > { %1301 = vmatpush.bf16.msra.mxu1 %v1920_v31  ;;  %v2261_v31 = vld [vmem:[%s3154_s15 + $0x358] sm:$0xf0]  ;;  %v2594_v16 = vld [vmem:[%s3154_s15 + $0x394] sm:$0xf]  ;;  %p2891_p8 = pnand %p2890_p6, %p3091_p7 }
  0xcb   : > { %1314 = vmatpush.bf16.msra.mxu2 %v1984_v32  ;;  %v2602_v32 = vld [vmem:[%s3154_s15 + $0x3d4] sm:$0xf]  ;;  %v2264_v36 = vor.u32 %v2586_v30, %v2261_v31  ;;  %v2576_v30 = vld [vmem:[%s3154_s15 + $0x304] sm:$0xf]  ;;  %v2221_v31 = vld [vmem:[%s3154_s15 + $0x308] sm:$0xf0] }
  0xcc   : > { %1327 = vmatpush.bf16.msra.mxu3 %v2048_v39  ;;  %v2552_v39 = vld [vmem:[%s3154_s15 + $0x244] sm:$0xf]  ;;  %p2892_p13 = pneg %p2891_p8 }
  0xcd   : > { %1289 = vmatpush.bf16.msra.mxu0 %v1848_v46  ;;  %v2128_v46 = vor.u32 %v2552_v39, %v2125_v40  ;;  %v2403_v40 = vld [vmem:[%s3166_s17 + $0x70] sm:$0xf] }
  0xce   : > { %1302 = vmatpush.bf16.msra.mxu1 %v1912_v49  ;;  %v2550_v49 = vld [vmem:[%s3154_s15 + $0x234] sm:$0xf]  ;;  %v2404_v43 = vor.u32 %v2623_v41, %v2403_v40 }
  0xcf   : > { %1315 = vmatpush.bf16.msra.mxu2 %v1976_v50  ;;  %v2117_v50 = vld [vmem:[%s3154_s15 + $0x238] sm:$0xf0] }
  0xd0   : > { %1328 = vmatpush.bf16.msra.mxu3 %v2040_v54  ;;  %v2582_v54 = vld [vmem:[%s3154_s15 + $0x334] sm:$0xf]  ;;  %v2120_v58 = vor.u32 %v2550_v49, %v2117_v50  ;;  %v2389_v49 = vld [vmem:[%s3166_s17 + $0x58] sm:$0xf0] }
  0xd1   : > { %1290 = vmatpush.bf16.msra.mxu0 %v1840_v61  ;;  %v2248_v60 = vor.u32 %v2582_v54, %v2245_v55  ;;  %v2548_v61 = vld [vmem:[%s3154_s15 + $0x224] sm:$0xf]  ;;  %v2616_v54 = vld [vmem:[%s3166_s17 + $0x44] sm:$0xf] }
  0xd2   : > { %1303 = vmatpush.bf16.msra.mxu1 %v1904_v1  ;;  %v2173_v1 = vld [vmem:[%s3154_s15 + $0x2a8] sm:$0xf0]  ;;  %v2384_v57 = vor.u32 %v2616_v54, %v2381_v56  ;;  %v2451_v54 = vld [vmem:[%s3166_s17 + $0xd0] sm:$0xf] }
  0xd3   : > { %1316 = vmatpush.bf16.msra.mxu2 %v1968_v2  ;;  %v2580_v2 = vld [vmem:[%s3154_s15 + $0x324] sm:$0xf] }
  0xd4   : > { %1329 = vmatpush.bf16.msra.mxu3 %v2032_v5  ;;  %1291 = vmatmul.bf16.vlgmr.msra.gmra.mxu0 %v3270_v18  ;;  %v2328_v18 = vor.u32 %v2602_v32, %v2325_v34  ;;  %v2301_v5 = vld [vmem:[%s3154_s15 + $0x3a8] sm:$0xf0]  ;;  %v2592_v32 = vld [vmem:[%s3154_s15 + $0x384] sm:$0xf] }
  0xd5   : > { %1335 = vmatpush.bf16.msrb.mxu0 %v2152_v6  ;;  %1304 = vmatmul.bf16.vlgmr.msra.gmra.mxu1 %v3277_v26  ;;  %v2317_v26 = vld [vmem:[%s3154_s15 + $0x3c8] sm:$0xf0]  ;;  %v2112_v6 = vor.u32 %v2548_v61, %v2109_v62  ;;  %v2373_v62 = vld [vmem:[%s3166_s17 + $0x38] sm:$0xf0] }
  0xd6   : > { %1348 = vmatpush.bf16.msrb.mxu1 %v2216_v7  ;;  %1317 = vmatmul.bf16.vlgmr.msra.gmra.mxu2 %v3268_v17  ;;  %v2200_v17 = vor.u32 %v2570_v27, %v2197_v29  ;;  %v2320_v52 = vor.u32 %v2600_v45, %v2317_v26  ;;  %v2176_v7 = vor.u32 %v2564_v63, %v2173_v1  ;;  %v2560_v27 = vld [vmem:[%s3154_s15 + $0x284] sm:$0xf]  ;;  %v2157_v29 = vld [vmem:[%s3154_s15 + $0x288] sm:$0xf0]  ;;  %v2620_v45 = vld [vmem:[%s3166_s17 + $0x64] sm:$0xf] }
  0xd7   : > { %1361 = vmatpush.bf16.msrb.mxu2 %v2280_v8  ;;  %1330 = vmatmul.bf16.vlgmr.msra.gmra.mxu3 %v3275_v25  ;;  %v2584_v25 = vld [vmem:[%s3154_s15 + $0x344] sm:$0xf]  ;;  %v2240_v8 = vor.u32 %v2580_v2, %v2237_v3  ;;  %v2285_v34 = vld [vmem:[%s3154_s15 + $0x388] sm:$0xf0]  ;;  %v2397_v26 = vld [vmem:[%s3166_s17 + $0x68] sm:$0xf0] }
  0xd8   : > { %1374 = vmatpush.bf16.msrb.mxu3 %v2344_v12  ;;  %v2256_v48 = vor.u32 %v2584_v25, %v2253_v44  ;;  %v2304_v12 = vor.u32 %v2596_v4, %v2301_v5  ;;  %v2288_v39 = vor.u32 %v2592_v32, %v2285_v34  ;;  %v2405_v25 = vld [vmem:[%s3166_s17 + $0x78] sm:$0xf0]  ;;  %v2613_v1 = vld [vmem:[%s3166_s17 + $0x24] sm:$0xf0]  ;;  %v2612_v2 = vld [vmem:[%s3166_s17 + $0x24] sm:$0xf] }
  0xd9   : > { %1336 = vmatpush.bf16.msrb.mxu0 %v2144_v20  ;;  %v2104_v20 = vor.u32 %v2546_v9, %v2101_v10  ;;  %v2365_v4 = vld [vmem:[%s3166_s17 + $0x28] sm:$0xf0]  ;;  %v3485_v5 = vld [vmem:[%s3164_s10] sm:$0x3]  ;;  %v2355_v9 = vld [vmem:[%s3166_s17 + $0x10] sm:$0xf] }
  0xda   : > { %1349 = vmatpush.bf16.msrb.mxu1 %v2208_v21  ;;  %v2168_v21 = vor.u32 %v2562_v11, %v2165_v13  ;;  %v2611_v10 = vld [vmem:[%s3166_s17 + $0x14] sm:$0xf0]  ;;  %v2610_v11 = vld [vmem:[%s3166_s17 + $0x14] sm:$0xf]  ;;  %s2893_s15 = scalar_lea.hbm %s3570_s5, 8 }
  0xdb   : > { %1362 = vmatpush.bf16.msrb.mxu2 %v2272_v22  ;;  %v2232_v22 = vor.u32 %v2578_v14, %v2229_v15  ;;  %v2356_v13 = vor.u32 %v2611_v10, %v2355_v9  ;;  %v2357_v14 = vld [vmem:[%s3166_s17 + $0x18] sm:$0xf0]  ;;  %v2630_v9 = vld [vmem:[%s3166_s17 + $0xb4] sm:$0xf]  ;;  %p2895_p11 = scmp.lt.s32.totalorder %s2893_s15, %s2889_s28 }
  0xdc   : > { %1375 = vmatpush.bf16.msrb.mxu3 %v2336_v28  ;;  %v2296_v28 = vor.u32 %v2594_v16, %v2293_v19  ;;  %v2360_v15 = vor.u32 %v2610_v11, %v2357_v14 }
  0xdd   : > { %1337 = vmatpush.bf16.msrb.mxu0 %v2136_v35  ;;  %v2096_v35 = vor.u32 %v2544_v23, %v2093_v24  ;;  %p2896_p1 = por %p2895_p11, %p2894_p5 }
  0xde   : > { %1350 = vmatpush.bf16.msrb.mxu1 %v2200_v17  ;;  %v2160_v17 = vor.u32 %v2560_v27, %v2157_v29  ;;  %v2349_v27 = vld [vmem:[%s3166_s17 + $0x8] sm:$0xf0] }
  0xdf   : > { %1363 = vmatpush.bf16.msrb.mxu2 %v2264_v36  ;;  %v2224_v36 = vor.u32 %v2576_v30, %v2221_v31  ;;  %p2897_p3 = pnand %p2896_p1, %p2892_p13 }
  0xe0   : > { %1376 = vmatpush.bf16.msrb.mxu3 %v2328_v18  ;;  %v2622_v18 = vld [vmem:[%s3166_s17 + $0x74] sm:$0xf] }
  0xe1   : > { %1338 = vmatpush.bf16.msrb.mxu0 %v2128_v46  ;;  %v2408_v44 = vor.u32 %v2622_v18, %v2405_v25  ;;  %v2619_v46 = vld [vmem:[%s3166_s17 + $0x54] sm:$0xf0] }
  0xe2   : > { %1351 = vmatpush.bf16.msrb.mxu1 %v2192_v47  ;;  %v2400_v47 = vor.u32 %v2620_v45, %v2397_v26 }
  0xe3   : > { %1364 = vmatpush.bf16.msrb.mxu2 %v2256_v48  ;;  %v2618_v48 = vld [vmem:[%s3166_s17 + $0x54] sm:$0xf] }
  0xe4   : > { %1377 = vmatpush.bf16.msrb.mxu3 %v2320_v52  ;;  %v2392_v51 = vor.u32 %v2618_v48, %v2389_v49  ;;  %v2379_v52 = vld [vmem:[%s3166_s17 + $0x40] sm:$0xf]  ;;  %v2637_v49 = vld [vmem:[%s3166_s17 + $0xe4] sm:$0xf0] }
  0xe5   : > { %1339 = vmatpush.bf16.msrb.mxu0 %v2120_v58  ;;  %v2380_v55 = vor.u32 %v2617_v53, %v2379_v52  ;;  %v2371_v58 = vld [vmem:[%s3166_s17 + $0x30] sm:$0xf]  ;;  %v2459_v48 = vld [vmem:[%s3166_s17 + $0xe0] sm:$0xf]  ;;  %v2461_v53 = vld [vmem:[%s3166_s17 + $0xe8] sm:$0xf0] }
  0xe6   : > { %1352 = vmatpush.bf16.msrb.mxu1 %v2184_v59  ;;  %v2615_v59 = vld [vmem:[%s3166_s17 + $0x34] sm:$0xf0]  ;;  %v2460_v52 = vor.u32 %v2637_v49, %v2459_v48 }
  0xe7   : > { %1365 = vmatpush.bf16.msrb.mxu2 %v2248_v60  ;;  %v2614_v60 = vld [vmem:[%s3166_s17 + $0x34] sm:$0xf]  ;;  %v2372_v61 = vor.u32 %v2615_v59, %v2371_v58  ;;  %v2453_v59 = vld [vmem:[%s3166_s17 + $0xd8] sm:$0xf0] }
  0xe8   : > { %1378 = vmatpush.bf16.msrb.mxu3 %v2312_v0  ;;  %v2376_v63 = vor.u32 %v2614_v60, %v2373_v62  ;;  %v2363_v0 = vld [vmem:[%s3166_s17 + $0x20] sm:$0xf]  ;;  %v2634_v58 = vld [vmem:[%s3166_s17 + $0xd4] sm:$0xf] }
  0xe9   : > { %1340 = vmatpush.bf16.msrb.mxu0 %v2112_v6  ;;  %v2364_v3 = vor.u32 %v2613_v1, %v2363_v0  ;;  %v2456_v62 = vor.u32 %v2634_v58, %v2453_v59  ;;  %v2443_v0 = vld [vmem:[%s3166_s17 + $0xc0] sm:$0xf]  ;;  %v2633_v1 = vld [vmem:[%s3166_s17 + $0xc4] sm:$0xf0] }
  0xea   : > { %1353 = vmatpush.bf16.msrb.mxu1 %v2176_v7  ;;  %v2368_v7 = vor.u32 %v2612_v2, %v2365_v4  ;;  %v2632_v2 = vld [vmem:[%s3166_s17 + $0xc4] sm:$0xf]  ;;  %v2445_v4 = vld [vmem:[%s3166_s17 + $0xc8] sm:$0xf0] }
  0xeb   : > { %1366 = vmatpush.bf16.msrb.mxu2 %v2240_v8 }
  0xec   : > { %1379 = vmatpush.bf16.msrb.mxu3 %v2304_v12  ;;  %v535_v12 = vperm.slane %v3485_v5, 0 }
  0xed   : > { %1341 = vmatpush.bf16.msrb.mxu0 %v2104_v20  ;;  %v2347_v20 = vld [vmem:[%s3166_s17] sm:$0xf] }
  0xee   : > { %1354 = vmatpush.bf16.msrb.mxu1 %v2168_v21  ;;  %v2609_v21 = vld [vmem:[%s3166_s17 + $0x4] sm:$0xf0] }
  0xef   : > { %1367 = vmatpush.bf16.msrb.mxu2 %v2232_v22  ;;  %v2608_v22 = vld [vmem:[%s3166_s17 + $0x4] sm:$0xf]  ;;  %v2348_v24 = vor.u32 %v2609_v21, %v2347_v20 }
  0xf0   : > { %1380 = vmatpush.bf16.msrb.mxu3 %v2296_v28  ;;  %v2352_v29 = vor.u32 %v2608_v22, %v2349_v27  ;;  %v2429_v22 = vld [vmem:[%s3166_s17 + $0xa8] sm:$0xf0] }
  0xf1   : > { %1342 = vmatpush.bf16.msrb.mxu0 %v2096_v35 }
  0xf2   : > { %1355 = vmatpush.bf16.msrb.mxu1 %v2160_v17 }
  0xf3   : > { %1368 = vmatpush.bf16.msrb.mxu2 %v2224_v36 }
  0xf4   : > { %1381 = vmatpush.bf16.msrb.mxu3 %v2288_v39  ;;  %1343 = vmatmul.bf16.vlgmr.msrb.gmra.mxu0 %v3328_v37  ;;  %v2395_v37 = vld [vmem:[%s3166_s17 + $0x60] sm:$0xf] }
  0xf5   : > { %1356 = vmatmul.bf16.vlgmr.msrb.gmra.mxu1 %v3334_v42  ;;  %1589 = vmatpush.bf16.msra.mxu0 %v2404_v43  ;;  %v2621_v42 = vld [vmem:[%s3166_s17 + $0x64] sm:$0xf0] }
  0xf6   : > { %1369 = vmatmul.bf16.vlgmr.msrb.gmra.mxu2 %v3323_v33  ;;  %v2396_v33 = vor.u32 %v2621_v42, %v2395_v37  ;;  %v2639_v37 = vld [vmem:[%s3166_s17 + $0xf4] sm:$0xf0]  ;;  %v2638_v42 = vld [vmem:[%s3166_s17 + $0xf4] sm:$0xf] }
  0xf7   : > { %1382 = vmatmul.bf16.vlgmr.msrb.gmra.mxu3 %v3330_v38  ;;  %1615 = vmatpush.bf16.msra.mxu2 %v2408_v44  ;;  %v2387_v38 = vld [vmem:[%s3166_s17 + $0x50] sm:$0xf] }
  0xf8   : > { %v2388_v50 = vor.u32 %v2619_v46, %v2387_v38  ;;  %v2467_v44 = vld [vmem:[%s3166_s17 + $0xf0] sm:$0xf]  ;;  %v2469_v38 = vld [vmem:[%s3166_s17 + $0xf8] sm:$0xf0] }
  0xf9   : > { %1590 = vmatpush.bf16.msra.mxu0 %v2396_v33  ;;  %v2468_v26 = vor.u32 %v2639_v37, %v2467_v44 }
  0xfb   : > { %1616 = vmatpush.bf16.msra.mxu2 %v2400_v47  ;;  %v2472_v47 = vor.u32 %v2638_v42, %v2469_v38  ;;  %1602 = vmatpush.bf16.msra.mxu1 %v2468_v26 }
  0xfd   : > { %1591 = vmatpush.bf16.msra.mxu0 %v2388_v50  ;;  %1628 = vmatpush.bf16.msra.mxu3 %v2472_v47  ;;  %v2636_v50 = vld [vmem:[%s3166_s17 + $0xe4] sm:$0xf] }
  0xff   : > { %1617 = vmatpush.bf16.msra.mxu2 %v2392_v51  ;;  %1603 = vmatpush.bf16.msra.mxu1 %v2460_v52 }
 0x101   : > { %1592 = vmatpush.bf16.msra.mxu0 %v2380_v55  ;;  %v2635_v55 = vld [vmem:[%s3166_s17 + $0xd4] sm:$0xf0] }
 0x103   : > { %1618 = vmatpush.bf16.msra.mxu2 %v2384_v57  ;;  %v2464_v57 = vor.u32 %v2636_v50, %v2461_v53 }
 0x105   : > { %1593 = vmatpush.bf16.msra.mxu0 %v2372_v61  ;;  %1629 = vmatpush.bf16.msra.mxu3 %v2464_v57  ;;  %v2452_v61 = vor.u32 %v2635_v55, %v2451_v54 }
 0x107   : > { %1619 = vmatpush.bf16.msra.mxu2 %v2376_v63  ;;  %1604 = vmatpush.bf16.msra.mxu1 %v2452_v61  ;;  %v1423_v61 = vld [vmem:[%s331_s16] sm:$0x3] }
 0x109   : > { %1594 = vmatpush.bf16.msra.mxu0 %v2364_v3  ;;  %1630 = vmatpush.bf16.msra.mxu3 %v2456_v62  ;;  %v2444_v3 = vor.u32 %v2633_v1, %v2443_v0  ;;  %v1426_v0 = vperm.slane %v1423_v61, 1 }
 0x10b   : > { %1620 = vmatpush.bf16.msra.mxu2 %v2368_v7  ;;  %1605 = vmatpush.bf16.msra.mxu1 %v2444_v3  ;;  %v2435_v7 = vld [vmem:[%s3166_s17 + $0xb0] sm:$0xf] }
 0x10d   : > { %1595 = vmatpush.bf16.msra.mxu0 %v2356_v13 }
 0x10f   : > { %1621 = vmatpush.bf16.msra.mxu2 %v2360_v15  ;;  %v2427_v15 = vld [vmem:[%s3166_s17 + $0xa0] sm:$0xf] }
 0x111   : > { %1596 = vmatpush.bf16.msra.mxu0 %v2348_v24 }
 0x113   : > { %1622 = vmatpush.bf16.msra.mxu2 %v2352_v29  ;;  %v2627_v29 = vld [vmem:[%s3166_s17 + $0x94] sm:$0xf0] }
 0x114   : > { %v1188_v6 = vpop.f32.mrf.mxu0 }
 0x115   : > { %v1201_v8 = vpop.f32.mrf.mxu1  ;;  %v1189_v23 = vadd.f32 %v1188_v6, %v535_v12  ;;  %v2448_v6 = vor.u32 %v2632_v2, %v2445_v4  ;;  %v2437_v12 = vld [vmem:[%s3166_s17 + $0xb8] sm:$0xf0] }
 0x116   : > { %v2440_v14 = vor.u32 %v2630_v9, %v2437_v12 }
 0x117   : > { %v1202_v31 = vadd.f32 %v1201_v8, %v1189_v23  ;;  %v2631_v8 = vld [vmem:[%s3166_s17 + $0xb4] sm:$0xf0]  ;;  %1631 = vmatpush.bf16.msra.mxu3 %v2448_v6 }
 0x118   : > { %v2436_v11 = vor.u32 %v2631_v8, %v2435_v7 }
 0x119   : > { %v1214_v16 = vpop.f32.mrf.mxu2 }
 0x11a   : > { %v1215_v35 = vadd.f32 %v1214_v16, %v1202_v31  ;;  %1606 = vmatpush.bf16.msra.mxu1 %v2436_v11  ;;  %v2629_v16 = vld [vmem:[%s3166_s17 + $0xa4] sm:$0xf0] }
 0x11b   : > { %1632 = vmatpush.bf16.msra.mxu3 %v2440_v14  ;;  %v2428_v21 = vor.u32 %v2629_v16, %v2427_v15 }
 0x11c   : > { %v1227_v19 = vpop.f32.mrf.mxu3  ;;  %v1190_v28 = vpop.f32.mrf.mxu0 }
 0x11d   : > { %v1203_v30 = vpop.f32.mrf.mxu1  ;;  %v1228_v17 = vadd.f32 %v1227_v19, %v1215_v35  ;;  %v2628_v19 = vld [vmem:[%s3166_s17 + $0xa4] sm:$0xf]  ;;  %v2419_v28 = vld [vmem:[%s3166_s17 + $0x90] sm:$0xf] }
 0x11e   : > { %v2432_v24 = vor.u32 %v2628_v19, %v2429_v22  ;;  %1607 = vmatpush.bf16.msra.mxu1 %v2428_v21  ;;  %v2626_v30 = vld [vmem:[%s3166_s17 + $0x94] sm:$0xf] }
 0x120   : > { %1633 = vmatpush.bf16.msra.mxu3 %v2432_v24 }
 0x121   : > { %v1216_v32 = vpop.f32.mrf.mxu2 }
 0x122   : > { %v2420_v32 = vor.u32 %v2627_v29, %v2419_v28 }
 0x124   : > { %v1229_v34 = vpop.f32.mrf.mxu3  ;;  %1608 = vmatpush.bf16.msra.mxu1 %v2420_v32 }
 0x125   : > { %v2421_v34 = vld [vmem:[%s3166_s17 + $0x98] sm:$0xf0] }
 0x126   : > { %v2424_v35 = vor.u32 %v2626_v30, %v2421_v34 }
 0x128   : > { %1634 = vmatpush.bf16.msra.mxu3 %v2424_v35 }
 0x131   : > { %v1240_v36 = vpop.f32.mrf.mxu0 }
 0x132   : > { %v1241_v39 = vadd.f32 %v1240_v36, %v1228_v17  ;;  %v1253_v40 = vpop.f32.mrf.mxu1  ;;  %v536_v17 = vperm.slane %v3485_v5, 1  ;;  %v2411_v36 = vld [vmem:[%s3166_s17 + $0x80] sm:$0xf] }
 0x134   : > { %v1254_v41 = vadd.f32 %v1253_v40, %v1241_v39  ;;  %v2625_v39 = vld [vmem:[%s3166_s17 + $0x84] sm:$0xf0]  ;;  %v2624_v40 = vld [vmem:[%s3166_s17 + $0x84] sm:$0xf] }
 0x139   : > { %v1266_v18 = vpop.f32.mrf.mxu2  ;;  %v1242_v33 = vpop.f32.mrf.mxu0 }
 0x13a   : > { %v1267_v43 = vadd.f32 %v1266_v18, %v1254_v41  ;;  %v1279_v25 = vpop.f32.mrf.mxu3  ;;  %v1255_v46 = vpop.f32.mrf.mxu1  ;;  %v2412_v18 = vor.u32 %v2625_v39, %v2411_v36 }
 0x13c   : > { %v1280_v45 = vadd.f32 %v1279_v25, %v1267_v43  ;;  %v2413_v43 = vld [vmem:[%s3166_s17 + $0x88] sm:$0xf0]  ;;  %1609 = vmatpush.bf16.msra.mxu1 %v2412_v18 }
 0x13d   : > { %v2416_v44 = vor.u32 %v2624_v40, %v2413_v43 }
 0x13e   : > { %2715 = vtanh.f32 %v1280_v45 }
 0x13f   : > { %1635 = vmatpush.bf16.msra.mxu3 %v2416_v44 }
 0x141   : > { %v1268_v51 = vpop.f32.mrf.mxu2 }
 0x142   : > { %v1281_v56 = vpop.f32.mrf.mxu3 }
 0x144   : > { %v2716_v60 = vpop.eup %2715 }
 0x145   : > { %v1389_v63 = vpack.c.bf16 %v2716_v60, %v2716_v60 }
 0x147   : > { %1597 = vmatmul.bf16.vlgmr.msra.gmra.mxu0 %v1389_v63  ;;  %1623 = vmatmul.bf16.vlgmr.msra.gmra.mxu2 %v1389_v63  ;;  %v1425_v63 = vperm.slane %v1423_v61, 0 }
 0x151   : > { %v1292_v10 = vpop.f32.mrf.mxu0 }
 0x152   : > { %v1305_v13 = vpop.f32.mrf.mxu1  ;;  %v1293_v37 = vadd.f32 %v1292_v10, %v536_v17 }
 0x154   : > { %v1306_v42 = vadd.f32 %v1305_v13, %v1293_v37 }
 0x159   : > { %v1318_v20 = vpop.f32.mrf.mxu2  ;;  %v1294_v27 = vpop.f32.mrf.mxu0 }
 0x15a   : > { %v1331_v23 = vpop.f32.mrf.mxu3  ;;  %v1307_v31 = vpop.f32.mrf.mxu1  ;;  %v1319_v45 = vadd.f32 %v1318_v20, %v1306_v42 }
 0x15c   : > { %v1332_v33 = vadd.f32 %v1331_v23, %v1319_v45 }
 0x161   : > { %v1320_v41 = vpop.f32.mrf.mxu2 }
 0x162   : > { %v1333_v25 = vpop.f32.mrf.mxu3 }
 0x171   : > { %v1344_v26 = vpop.f32.mrf.mxu0 }
 0x172   : > { %v1357_v38 = vpop.f32.mrf.mxu1  ;;  %v1345_v46 = vadd.f32 %v1344_v26, %v1332_v33 }
 0x174   : > { %v1358_v5 = vadd.f32 %v1357_v38, %v1345_v46 }
 0x179   : > { %v1370_v47 = vpop.f32.mrf.mxu2  ;;  %v1346_v50 = vpop.f32.mrf.mxu0 }
 0x17a   : > { %v1371_v48 = vadd.f32 %v1370_v47, %v1358_v5  ;;  %v1383_v49 = vpop.f32.mrf.mxu3  ;;  %v1359_v51 = vpop.f32.mrf.mxu1 }
 0x17c   : > { %v1384_v52 = vadd.f32 %v1383_v49, %v1371_v48 }
 0x17e   : > { %2717 = vtanh.f32 %v1384_v52 }
 0x181   : > { %v1372_v53 = vpop.f32.mrf.mxu2 }
 0x182   : > { %v1385_v54 = vpop.f32.mrf.mxu3 }
 0x184   : > { %v2718_v55 = vpop.eup %2717 }
 0x185   : > { %v1390_v56 = vpack.c.bf16 %v2718_v55, %v2718_v55 }
 0x187   : > { %1610 = vmatmul.bf16.vlgmr.msra.gmra.mxu1 %v1390_v56  ;;  %1636 = vmatmul.bf16.vlgmr.msra.gmra.mxu3 %v1390_v56 }
 0x1c4   : > { %v1598_v57 = vpop.f32.mrf.mxu0 }
 0x1c5   : > { %v1599_v1 = vadd.f32 %v1598_v57, %v1425_v63 }
 0x1ca   : > { %v1624_v58 = vpop.f32.mrf.mxu2 }
 0x1cb   : > { %v1625_v2 = vadd.f32 %v1624_v58, %v1426_v0 }
 0x1cc   : > { %v1600_v59 = vpop.f32.mrf.mxu0 }
 0x1d2   : > { %v1626_v60 = vpop.f32.mrf.mxu2 }
 0x204   : > { %v1611_v62 = vpop.f32.mrf.mxu1 }
 0x205   : > { %v1612_v4 = vadd.f32 %v1611_v62, %v1599_v1 }
 0x20a   : > { %v1637_v3 = vpop.f32.mrf.mxu3 }
 0x20b   : > { %v1638_v6 = vadd.f32 %v1637_v3, %v1625_v2 }
 0x20c   : > { %v1613_v7 = vpop.f32.mrf.mxu1 }
 0x20d   : > { %2719 = vtanh.f32 %v1638_v6 }
 0x20e   : > { %2721 = vtanh.f32 %v1612_v4 }
 0x212   : > { %v1639_v8 = vpop.f32.mrf.mxu3 }
 0x213   : > { %v2720_v9 = vpop.eup %2719 }
 0x214   : > { %v1645_v10 = vrot.slane %v2720_v9, 6  ;;  %v2722_v11 = vpop.eup %2721 }
 0x216   : > { %v1647_v12 = vsel %vm1646_vm0, %v2722_v11, %v1645_v10 }
 0x217   : > { %1649 = vst [vmem:[%s373_s27] sm:$0xf] %v1647_v12 }
 0x218   : > { %2900 = shalt.err (!%p2897_p3)
}
 0x219   : > { %2653 = dma.vmem_to_hbm [thread:$0]  (%p3091_p7), %s1665_s0, 64, %s1667_s13, %s1651_s26  }
 0x21a PF: > { %s1678_s6 = sand.u32 1, %s2935_s18   ;;  %p3583_p2 = scmp.ge.s32.totalorder %s2947_s21, 2 }
 0x21b   : > { %s1679_s10 = scalar_lea.sflag [#allocation4], %s1678_s6 }
 0x21c   : > { %p2673_p4 = pnand %p3583_p2, %p3095_p9 }
 0x21e   : > { %p2674_p10 = pneg %p2673_p4 }
 0x220   : > { %2930 = dma.done.wait (%p2674_p10), %s1679_s10, 64  }
 0x221   : > { %2932 = vsyncadd (%p2674_p10), %s1679_s10, 4294967232  ;;  %s3584_s9 = sld [smem:[#allocation16_spill]]  ;;  %p22_p0 = scmp.ge.s32.totalorder %s3003_s22, 4  }
 0x222   : > { %s3585_s18 = smov %s2939_s19  ;;  %s3586_s19 = smov %s2943_s20 }
 0x223   : > { %s3588_s21 = smov %s3003_s22  ;;  %24 = sbr.rel (!%p22_p0) target bundleno = 12 (0xc), region = 126 }
 0x227   : > { %s3587_s20 = smov %s3584_s9 }
 0x228   :  { %1685 = vsyncpa [#allocation3], 1 }
 0x229   :  { %1687 = vsyncpa [#allocation3 + $0x1], 1 }
 0x22a   :  { %1688 = vsyncpa [#allocation6], 1 }
 0x22b   :  { %1690 = vsyncpa [#allocation6 + $0x1], 1 }
 0x22c   :  { %1691 = vsyncpa [#allocation9], 1 }
 0x22d   :  { %1693 = vsyncpa [#allocation9 + $0x1], 1 }
 0x22e   :  { %1694 = vsyncpa [#allocation4], 1 }
 0x22f   :  { %1696 = vsyncpa [#allocation4 + $0x1], 1 }

</bundles_post_ra>
